<compile_context>
chip_gen: v7x
topology: tpu7x:2x2x1
jax: 0.10.0
libtpu: 0.0.40
codegen_flags: <defaults>
</compile_context>

<pallas_src>
import functools

import jax
import jax.numpy as jnp
from jax.experimental import pallas as pl
from jax.experimental.pallas import tpu as pltpu


def _round_up(x, m):
    return ((x + m - 1) // m) * m


_NEG = -1e30  # stand-in for log(0); avoids -inf/NaN for fully-masked rows


# ----------------------------- Pallas kernel --------------------------------
def net_kernel(
    # batched inputs (TB rows per grid step)
    dec_ref,      # (TB, K)        [prebox_p | heightmap] fused decoder input
    box_ref,      # (TB, N, BDP)   box states (feature dim padded to BDP)
    mask_ref,     # (TB, N)        valid_mask * access_mask (float 0/1)
    hh_ref,       # (TB, HP)       last GRU hidden state (lane-padded H -> HP)
    # weights (replicated, pre-folded + gate-padded on host)
    w_dec_ref,    # (K, 3*HP)      encoders folded into GRU input-gate weights
    whh_ref,      # (HP, 3*HP)     GRU W_hh^T
    w_box_ref,    # (BDP, 3*HP)    [w_obj | w_obj@w1k | w_obj@w2k]
    wq_ref,       # (HP, 2*HP)     [w1q | w2q]
    v12_ref,      # (2, HP)        [v1 ; v2]
    b_ref,        # (1, 7*HP)      [b_gi (+ b_hh r/z) | b_hh n | b_box]
    # outputs
    probs_ref,    # (TB, NP)       lane-dense probabilities (cols >= N are exact 0)
    hh_out_ref,   # (TB, HP)       new GRU hidden state
    *,
    bf16_tanh,
):
    f32 = jnp.float32
    TB, N, BDP = box_ref.shape
    HP = hh_ref.shape[-1]
    NP = probs_ref.shape[-1]
    H3 = 3 * HP

    b_gi = b_ref[:, 0:H3]                 # (1, 3HP)  (contains b_hh's r/z thirds)
    b_hhn = b_ref[:, H3:H3 + HP]          # (1, HP)
    b_box = b_ref[:, H3 + HP:]            # (1, 3HP)

    # ---- PackDecoder: single-step GRU; encoders + both input streams fused ---
    h = hh_ref[...]                                                     # (TB, HP)
    gi = jnp.dot(dec_ref[...], w_dec_ref[...],
                 preferred_element_type=f32) + b_gi                     # (TB, 3HP)
    gh = jnp.dot(h, whh_ref[...], preferred_element_type=f32)           # (TB, 3HP)
    # all slices below are 128-lane-tile aligned (HP = 128 multiple)
    r = jax.nn.sigmoid(gi[:, 0:HP] + gh[:, 0:HP])
    z = jax.nn.sigmoid(gi[:, HP:2 * HP] + gh[:, HP:2 * HP])
    n = jnp.tanh(gi[:, 2 * HP:] + r * (gh[:, 2 * HP:] + b_hhn))
    h_new = (1.0 - z) * n + z * h                                       # (TB, HP)
    hh_out_ref[...] = h_new                                             # dense store

    # ---- ObjectEncoder stand-in + both attention key projections, fused ------
    # TODO(synk): ObjectEncoder's definition is not in the provided source;
    # replaced with a per-box linear projection (precedences ignored).
    box2d = box_ref[...].reshape(TB * N, BDP)
    fused = jnp.dot(box2d, w_box_ref[...],
                    preferred_element_type=f32) + b_box                 # (TB*N, 3HP)
    keys = fused[:, 0:HP].reshape(TB, N, HP)
    k1 = fused[:, HP:2 * HP].reshape(TB, N, HP)      # keys @ w1k (pre-folded)
    k2 = fused[:, 2 * HP:].reshape(TB, N, HP)        # keys @ w2k (pre-folded)

    def _tanh(x):
        # bf16 EUP path on v6e/v7x only; v5e has no bf16 VPU/EUP.
        return jnp.tanh(x.astype(jnp.bfloat16)) if bf16_tanh else jnp.tanh(x)

    v1 = v12_ref[0:1, :]                  # (1, HP)
    v2 = v12_ref[1:2, :]                  # (1, HP)

    # ---- StrategyAttention stage 1 (lane-major softmax over the N boxes) -----
    q1 = jnp.dot(h_new, wq_ref[:, 0:HP], preferred_element_type=f32)    # (TB, HP)
    t1 = _tanh(k1 + q1[:, None, :])                                     # (TB, N, HP)
    s1 = jnp.sum(t1 * v1, axis=-1)                                      # (TB, N) f32
    e1 = jnp.exp(s1 - jnp.max(s1, axis=-1, keepdims=True))
    attns = e1 * pl.reciprocal(jnp.sum(e1, axis=-1, keepdims=True), approx=True)
    # batched (1,N)@(N,HP) per row -- same pattern as the flash-attn pv einsum
    new_query = jnp.einsum("bqn,bnh->bqh", attns[:, None, :], keys,
                           preferred_element_type=f32)[:, 0, :]          # (TB, HP)

    # ---- StrategyAttention stage 2 --------------------------------------------
    q2 = jnp.dot(new_query, wq_ref[:, HP:], preferred_element_type=f32)  # (TB, HP)
    t2 = _tanh(k2 + q2[:, None, :])                                      # (TB, N, HP)
    s2 = jnp.sum(t2 * v2, axis=-1)                                       # (TB, N)

    # ---- Net.forward: masked softmax over the N boxes, lane-dense store ------
    score = jnp.where(mask_ref[...] > 0.0, s2, _NEG)                     # (TB, N)
    if NP > N:
        # pad to a full 128-lane tile with "log(0)"; exp underflows to exact 0,
        # so the store is a dense unmasked vst and the normalization is unchanged.
        score = jnp.concatenate(
            [score, jnp.full((TB, NP - N), _NEG, f32)], axis=-1)          # (TB, NP)
    m2 = jnp.max(score, axis=-1, keepdims=True)
    e2 = jnp.exp(score - m2)
    probs_ref[...] = e2 * pl.reciprocal(
        jnp.sum(e2, axis=-1, keepdims=True), approx=True)


# ----------------------- host-side exact weight folding ----------------------
def _fold_and_pad_params(p, H, HP):
    hi = jax.lax.Precision.HIGHEST

    def pad_last(w, pad):
        return jnp.pad(w, [(0, 0)] * (w.ndim - 1) + [(0, pad)])

    def pad_gates(w):  # (..., 3H) -> (..., 3HP), zero-pad each gate block
        r, z, n = jnp.split(w, 3, axis=-1)
        return jnp.concatenate(
            [pad_last(r, HP - H), pad_last(z, HP - H), pad_last(n, HP - H)],
            axis=-1)

    # encoder linears folded into the GRU input gates; both input streams stacked
    w_dec = jnp.concatenate(
        [jnp.dot(p["w_pre"], p["wih_pre"], precision=hi),
         jnp.dot(p["w_hm"], p["wih_hm"], precision=hi)], axis=0)         # (K, 3H)
    b_gi = (jnp.dot(p["b_pre"], p["wih_pre"], precision=hi)
            + jnp.dot(p["b_hm"], p["wih_hm"], precision=hi) + p["b_ih"])  # (1, 3H)
    # b_hh's r/z thirds are purely additive with b_gi -> fold; keep the n third
    b_gi = b_gi.at[:, :2 * H].add(p["b_hh"][:, :2 * H])
    b_hhn = p["b_hh"][:, 2 * H:]                                          # (1, H)

    # object-encoder stand-in fused with both attention key projections
    w_box = jnp.concatenate(
        [p["w_obj"],
         jnp.dot(p["w_obj"], p["w1k"], precision=hi),
         jnp.dot(p["w_obj"], p["w2k"], precision=hi)], axis=1)            # (BDP, 3H)
    b_box = jnp.concatenate(
        [p["b_obj"],
         jnp.dot(p["b_obj"], p["w1k"], precision=hi),
         jnp.dot(p["b_obj"], p["w2k"], precision=hi)], axis=1)            # (1, 3H)

    pad_h = HP - H
    w_dec_p = pad_gates(w_dec)                                            # (K, 3HP)
    whh_p = pad_gates(jnp.pad(p["whh"], ((0, pad_h), (0, 0))))            # (HP, 3HP)
    w_box_p = pad_gates(w_box)                                            # (BDP, 3HP)
    wq_p = jnp.concatenate(
        [jnp.pad(p["w1q"], ((0, pad_h), (0, pad_h))),
         jnp.pad(p["w2q"], ((0, pad_h), (0, pad_h)))], axis=1)            # (HP, 2HP)
    v12_p = jnp.concatenate(
        [pad_last(p["v1"], pad_h), pad_last(p["v2"], pad_h)], axis=0)     # (2, HP)
    b_all = jnp.concatenate(
        [pad_gates(b_gi), pad_last(b_hhn, pad_h), pad_gates(b_box)],
        axis=1)                                                           # (1, 7HP)
    return w_dec_p, whh_p, w_box_p, wq_p, v12_p, b_all


# ----------------------------- host wrapper ---------------------------------
def net_forward_pallas(inputs, params, training=True, bf16_tanh=None):
    box_p = inputs["box_p"]        # (B, N, BDP)
    prebox_p = inputs["prebox_p"]  # (B, BDP)
    hm_flat = inputs["hm_flat"]    # (B, HMF)
    mask = inputs["mask"]          # (B, N)
    hh = inputs["hh"]              # (B, H)

    B, N, BDP = box_p.shape
    H = hh.shape[-1]
    HP = _round_up(H, 128)         # lane-pad hidden so every gate slice is tile-aligned
    NP = _round_up(N, 128)         # lane-dense probs width

    kind = jax.devices()[0].device_kind.lower()
    if bf16_tanh is None:
        bf16_tanh = ("v6" in kind) or ("v7" in kind)   # bf16 EUP only on v6e/v7x
    two_cores = "v7" in kind

    weights = list(_fold_and_pad_params(params, H, HP))

    dec_in = jnp.concatenate([prebox_p, hm_flat], axis=1)   # (B, K) fused GRU input
    hh_p = jnp.pad(hh, ((0, 0), (0, HP - H)))                # (B, HP)

    # ---- batch coarsening: up to 128 rows per grid step amortizes the ~0.35us
    # per-step overhead; on v7x keep >=2 "parallel" steps so both TCs get work.
    Bp8 = _round_up(B, 8)
    TB = min(128, Bp8)
    if two_cores and Bp8 >= 16 and Bp8 < 2 * TB:
        TB = _round_up(max(Bp8 // 2, 8), 8)
    Bp = _round_up(B, TB)
    G = Bp // TB

    if Bp != B:
        pad = Bp - B
        box_p = jnp.pad(box_p, ((0, pad), (0, 0), (0, 0)))
        dec_in = jnp.pad(dec_in, ((0, pad), (0, 0)))
        mask = jnp.pad(mask, ((0, pad), (0, 0)))
        hh_p = jnp.pad(hh_p, ((0, pad), (0, 0)))

    def batch_spec(block_shape):
        nd = len(block_shape)
        return pl.BlockSpec(tuple(block_shape),
                            lambda b, _n=nd: (b,) + (0,) * (_n - 1))

    def rep_spec(shape):
        nd = len(shape)
        return pl.BlockSpec(tuple(shape), lambda b, _n=nd: (0,) * _n)

    K = dec_in.shape[-1]
    in_specs = (
        [batch_spec((TB, K)), batch_spec((TB, N, BDP)),
         batch_spec((TB, N)), batch_spec((TB, HP))]
        + [rep_spec(w.shape) for w in weights]
    )
    out_specs = [batch_spec((TB, NP)), batch_spec((TB, HP))]
    out_shape = [jax.ShapeDtypeStruct((Bp, NP), jnp.float32),
                 jax.ShapeDtypeStruct((Bp, HP), jnp.float32)]

    probs_full, hh_full = pl.pallas_call(
        functools.partial(net_kernel, bf16_tanh=bf16_tanh),
        out_shape=out_shape,
        grid_spec=pltpu.PrefetchScalarGridSpec(
            num_scalar_prefetch=0,
            grid=(G,),
            in_specs=in_specs,
            out_specs=out_specs,
        ),
        compiler_params=pltpu.CompilerParams(
            dimension_semantics=("parallel",)),
    )(dec_in, box_p, mask, hh_p, *weights)

    probs = probs_full[:B, :N]
    last_hh = hh_full[:B, :H][None]      # (1, B, H) like PyTorch GRU hidden

    if not training:
        # eval-mode hardening from Net.forward (plain-JAX glue)
        pmax = jnp.max(probs, axis=1, keepdims=True)
        hard = jnp.where(probs == pmax, 1.0, 0.0)
        probs = hard / jnp.sum(hard, axis=1, keepdims=True)
    return probs, last_hh


# ----------------------------- pure-JAX reference ---------------------------
def net_forward_ref(inputs, params):
    box_p = inputs["box_p"]
    prebox_p = inputs["prebox_p"]
    hm_flat = inputs["hm_flat"]
    mask = inputs["mask"]
    hh = inputs["hh"]
    p = params

    pre_vec = prebox_p @ p["w_pre"] + p["b_pre"]
    hm_vec = hm_flat @ p["w_hm"] + p["b_hm"]
    gi = pre_vec @ p["wih_pre"] + hm_vec @ p["wih_hm"] + p["b_ih"]
    gh = hh @ p["whh"] + p["b_hh"]
    H = hh.shape[-1]
    r = jax.nn.sigmoid(gi[:, :H] + gh[:, :H])
    z = jax.nn.sigmoid(gi[:, H:2 * H] + gh[:, H:2 * H])
    n = jnp.tanh(gi[:, 2 * H:] + r * gh[:, 2 * H:])
    h_new = (1.0 - z) * n + z * hh

    keys = jnp.einsum("bnd,dh->bnh", box_p, p["w_obj"]) + p["b_obj"]
    t1 = jnp.tanh(jnp.einsum("bnh,hk->bnk", keys, p["w1k"])
                  + (h_new @ p["w1q"])[:, None, :])
    s1 = jnp.sum(t1 * p["v1"][None], axis=-1)
    attns = jax.nn.softmax(s1, axis=-1)
    new_query = jnp.einsum("bn,bnh->bh", attns, keys)
    t2 = jnp.tanh(jnp.einsum("bnh,hk->bnk", keys, p["w2k"])
                  + (new_query @ p["w2q"])[:, None, :])
    s2 = jnp.sum(t2 * p["v2"][None], axis=-1)
    probs = jax.nn.softmax(s2 + jnp.log(mask), axis=-1)
    return probs, h_new[None]


# ----------------------------- parameter init -------------------------------
def make_params(key, H, HALF, BDP, HMF):
    def xavier(k, shape, fan_in, fan_out):
        a = (6.0 / (fan_in + fan_out)) ** 0.5
        return jax.random.uniform(k, shape, jnp.float32, -a, a)

    ks = jax.random.split(key, 16)
    # GRU weights (PyTorch layout: W_ih (3H, H), W_hh (3H, H)) -> transposed
    w_ih_T = xavier(ks[0], (H, 3 * H), H, 3 * H)
    w_hh_T = xavier(ks[1], (H, 3 * H), H, 3 * H)
    W1 = xavier(ks[2], (H, 2 * H), H, 2 * H)
    W2 = xavier(ks[3], (H, 2 * H), H, 2 * H)
    params = {
        "w_obj": xavier(ks[4], (BDP, H), BDP, H),
        "b_obj": jax.random.uniform(ks[5], (1, H), jnp.float32, -0.1, 0.1),
        "w_pre": xavier(ks[6], (BDP, HALF), BDP, HALF),
        "b_pre": jax.random.uniform(ks[7], (1, HALF), jnp.float32, -0.1, 0.1),
        "w_hm": xavier(ks[8], (HMF, HALF), HMF, HALF),
        "b_hm": jax.random.uniform(ks[9], (1, HALF), jnp.float32, -0.1, 0.1),
        "wih_pre": w_ih_T[:HALF, :],
        "wih_hm": w_ih_T[HALF:, :],
        "b_ih": jax.random.uniform(ks[10], (1, 3 * H), jnp.float32, -0.1, 0.1),
        "whh": w_hh_T,
        "b_hh": jax.random.uniform(ks[11], (1, 3 * H), jnp.float32, -0.1, 0.1),
        "w1k": W1[:, :H].T,
        "w1q": W1[:, H:].T,
        "v1": xavier(ks[12], (1, H), 1, H),
        "w2k": W2[:, :H].T,
        "w2q": W2[:, H:].T,
        "v2": xavier(ks[13], (1, H), 1, H),
    }
    return params


# ----------------------------- main ------------------------------------------
if __name__ == "__main__":
    # small shapes: batch=2, state_num (boxes)=8, box_dim=3 (padded to 8),
    # hidden_dim=32, heightmap = 2 x 8 x 8
    B, N, BD, BDP = 2, 8, 3, 8
    H, HALF = 32, 16
    HW, HL = 8, 8
    HMF = 2 * HW * HL

    root = jax.random.PRNGKey(0)
    k_box, k_pre, k_hm, k_hh, k_m1, k_m2, k_par = jax.random.split(root, 7)

    box = jax.random.normal(k_box, (B, N, BD), jnp.float32)
    pre_box = jax.random.uniform(k_pre, (B, BD), jnp.float32)
    heightmap = jax.random.uniform(k_hm, (B, 2, HW, HL), jnp.float32)
    last_hh = jax.random.normal(k_hh, (1, B, H), jnp.float32) * 0.1
    valid_mask = (jax.random.uniform(k_m1, (B, N)) > 0.3).astype(jnp.float32)
    access_mask = (jax.random.uniform(k_m2, (B, N)) > 0.2).astype(jnp.float32)
    # TODO(synk): obs_to_tensor is not provided; tensors are built directly and
    # at least one valid entry per row is guaranteed (fully-masked rows would be
    # NaN in the PyTorch reference's log(mask) path).
    mask = (valid_mask * access_mask).at[:, 0].set(1.0)

    # pad box feature dim 3 -> 8 (padded features are zero, so the math is identical)
    box_p = jnp.concatenate(
        [box, jnp.zeros((B, N, BDP - BD), jnp.float32)], axis=-1)
    prebox_p = jnp.concatenate(
        [pre_box, jnp.zeros((B, BDP - BD), jnp.float32)], axis=-1)

    inputs = {
        "box_p": box_p,                        # (B, N, BDP)
        "prebox_p": prebox_p,                  # (B, BDP)
        "hm_flat": heightmap.reshape(B, HMF),  # (B, HMF)
        "mask": mask,                          # (B, N)
        "hh": last_hh[0],                      # (B, H)
    }
    params = make_params(k_par, H, HALF, BDP, HMF)

    kind = jax.devices()[0].device_kind.lower()
    bf16 = ("v6" in kind) or ("v7" in kind)    # attention tanh runs in bf16 there

    probs, new_hh = net_forward_pallas(inputs, params, training=True,
                                       bf16_tanh=bf16)
    probs = jax.block_until_ready(probs)
    new_hh = jax.block_until_ready(new_hh)

    probs_ref, hh_ref = net_forward_ref(inputs, params)
    assert probs.shape == (B, N) and new_hh.shape == (1, B, H)
    # GRU path is always f32 (default MXU precision, f32 accumulate) -> tight tol.
    assert jnp.allclose(new_hh, hh_ref, atol=2e-4, rtol=2e-4)
    # probs pass through two approx-reciprocal softmaxes; on v6e/v7x the attention
    # tanh additionally runs in bf16, so widen the tolerance on that path only.
    probs_tol = 5e-2 if bf16 else 1e-3
    assert jnp.allclose(probs, probs_ref, atol=probs_tol, rtol=probs_tol)
    assert jnp.allclose(jnp.sum(probs, axis=1), jnp.ones((B,)), atol=2e-3)

    print("KERNEL_OK")
</pallas_src>

<mosaic_0001>
module attributes {stable_mosaic.version = 11 : i64} {
  func.func @net_kernel(%arg0: i32, %arg1: memref<8x136xf32, #tpu.memory_space<vmem>>, %arg2: memref<8x8x8xf32, #tpu.memory_space<vmem>>, %arg3: memref<8x8xf32, #tpu.memory_space<vmem>>, %arg4: memref<8x128xf32, #tpu.memory_space<vmem>>, %arg5: memref<136x384xf32, #tpu.memory_space<vmem>>, %arg6: memref<128x384xf32, #tpu.memory_space<vmem>>, %arg7: memref<8x384xf32, #tpu.memory_space<vmem>>, %arg8: memref<128x256xf32, #tpu.memory_space<vmem>>, %arg9: memref<2x128xf32, #tpu.memory_space<vmem>>, %arg10: memref<1x896xf32, #tpu.memory_space<vmem>>, %arg11: memref<8x128xf32, #tpu.memory_space<vmem>>, %arg12: memref<8x128xf32, #tpu.memory_space<vmem>>) attributes {dimension_semantics = [#tpu.dimension_semantics<parallel>], iteration_bounds = array<i64: 1>, scalar_prefetch = 0 : i64, scratch_operands = 0 : i64, tpu.core_type = #tpu.core_type<tc>, window_params = [{transform_indices = @transform_0, window_bounds = array<i64: 8, 136>}, {transform_indices = @transform_1, window_bounds = array<i64: 8, 8, 8>}, {transform_indices = @transform_2, window_bounds = array<i64: 8, 8>}, {transform_indices = @transform_3, window_bounds = array<i64: 8, 128>}, {pipeline_mode = #tpu.pipeline_mode<synchronous>, transform_indices = @transform_4, window_bounds = array<i64: 136, 384>}, {pipeline_mode = #tpu.pipeline_mode<synchronous>, transform_indices = @transform_5, window_bounds = array<i64: 128, 384>}, {pipeline_mode = #tpu.pipeline_mode<synchronous>, transform_indices = @transform_6, window_bounds = array<i64: 8, 384>}, {pipeline_mode = #tpu.pipeline_mode<synchronous>, transform_indices = @transform_7, window_bounds = array<i64: 128, 256>}, {pipeline_mode = #tpu.pipeline_mode<synchronous>, transform_indices = @transform_8, window_bounds = array<i64: 2, 128>}, {pipeline_mode = #tpu.pipeline_mode<synchronous>, transform_indices = @transform_9, window_bounds = array<i64: 1, 896>}, {transform_indices = @transform_10, window_bounds = array<i64: 8, 128>}, {transform_indices = @transform_11, window_bounds = array<i64: 8, 128>}]} {
    %c0 = arith.constant 0 : index
    %c0_0 = arith.constant 0 : index
    %0 = vector.load %arg10[%c0, %c0_0] : memref<1x896xf32, #tpu.memory_space<vmem>>, vector<1x384xf32>
    %c0_1 = arith.constant 0 : index
    %c384 = arith.constant 384 : index
    %1 = vector.load %arg10[%c0_1, %c384] : memref<1x896xf32, #tpu.memory_space<vmem>>, vector<1x128xf32>
    %c0_2 = arith.constant 0 : index
    %c512 = arith.constant 512 : index
    %2 = vector.load %arg10[%c0_2, %c512] : memref<1x896xf32, #tpu.memory_space<vmem>>, vector<1x384xf32>
    %c0_3 = arith.constant 0 : index
    %c0_4 = arith.constant 0 : index
    %3 = vector.load %arg4[%c0_3, %c0_4] : memref<8x128xf32, #tpu.memory_space<vmem>>, vector<8x128xf32>
    %c0_5 = arith.constant 0 : index
    %c0_6 = arith.constant 0 : index
    %4 = vector.load %arg1[%c0_5, %c0_6] : memref<8x136xf32, #tpu.memory_space<vmem>>, vector<8x136xf32>
    %c0_7 = arith.constant 0 : index
    %c0_8 = arith.constant 0 : index
    %5 = vector.load %arg5[%c0_7, %c0_8] : memref<136x384xf32, #tpu.memory_space<vmem>>, vector<136x384xf32>
    %cst = arith.constant dense<0.000000e+00> : vector<8x384xf32>
    %6 = tpu.matmul %4, %5, %cst {dimension_numbers = #tpu.dot_dimension_numbers<[1], [0], [0], [1], [0, 0, 1, 1], [], []>} : vector<8x136xf32>, vector<136x384xf32>, vector<8x384xf32> -> vector<8x384xf32>
    %7 = vector.broadcast %0 : vector<1x384xf32> to vector<8x384xf32>
    %8 = arith.addf %6, %7 : vector<8x384xf32>
    %c0_9 = arith.constant 0 : index
    %c0_10 = arith.constant 0 : index
    %9 = vector.load %arg6[%c0_9, %c0_10] : memref<128x384xf32, #tpu.memory_space<vmem>>, vector<128x384xf32>
    %cst_11 = arith.constant dense<0.000000e+00> : vector<8x384xf32>
    %10 = tpu.matmul %3, %9, %cst_11 {dimension_numbers = #tpu.dot_dimension_numbers<[1], [0], [0], [1], [0, 0, 1, 1], [], []>} : vector<8x128xf32>, vector<128x384xf32>, vector<8x384xf32> -> vector<8x384xf32>
    %11 = vector.extract_strided_slice %8 {offsets = [0, 0], sizes = [8, 128], strides = [1, 1]} : vector<8x384xf32> to vector<8x128xf32>
    %12 = vector.extract_strided_slice %10 {offsets = [0, 0], sizes = [8, 128], strides = [1, 1]} : vector<8x384xf32> to vector<8x128xf32>
    %13 = arith.addf %11, %12 : vector<8x128xf32>
    %14 = arith.negf %13 : vector<8x128xf32>
    %15 = math.exp %14 : vector<8x128xf32>
    %cst_12 = arith.constant 1.000000e+00 : f32
    %16 = vector.broadcast %cst_12 : f32 to vector<8x128xf32>
    %17 = arith.addf %16, %15 : vector<8x128xf32>
    %18 = arith.divf %16, %17 : vector<8x128xf32>
    %19 = vector.extract_strided_slice %8 {offsets = [0, 128], sizes = [8, 128], strides = [1, 1]} : vector<8x384xf32> to vector<8x128xf32>
    %20 = vector.extract_strided_slice %10 {offsets = [0, 128], sizes = [8, 128], strides = [1, 1]} : vector<8x384xf32> to vector<8x128xf32>
    %21 = arith.addf %19, %20 : vector<8x128xf32>
    %22 = arith.negf %21 : vector<8x128xf32>
    %23 = math.exp %22 : vector<8x128xf32>
    %cst_13 = arith.constant 1.000000e+00 : f32
    %24 = vector.broadcast %cst_13 : f32 to vector<8x128xf32>
    %25 = arith.addf %24, %23 : vector<8x128xf32>
    %26 = arith.divf %24, %25 : vector<8x128xf32>
    %27 = vector.extract_strided_slice %8 {offsets = [0, 256], sizes = [8, 128], strides = [1, 1]} : vector<8x384xf32> to vector<8x128xf32>
    %28 = vector.extract_strided_slice %10 {offsets = [0, 256], sizes = [8, 128], strides = [1, 1]} : vector<8x384xf32> to vector<8x128xf32>
    %29 = vector.broadcast %1 : vector<1x128xf32> to vector<8x128xf32>
    %30 = arith.addf %28, %29 : vector<8x128xf32>
    %31 = arith.mulf %18, %30 : vector<8x128xf32>
    %32 = arith.addf %27, %31 : vector<8x128xf32>
    %33 = math.tanh %32 : vector<8x128xf32>
    %cst_14 = arith.constant 1.000000e+00 : f32
    %34 = vector.broadcast %cst_14 : f32 to vector<8x128xf32>
    %35 = arith.subf %34, %26 : vector<8x128xf32>
    %36 = arith.mulf %35, %33 : vector<8x128xf32>
    %37 = arith.mulf %26, %3 : vector<8x128xf32>
    %38 = arith.addf %36, %37 : vector<8x128xf32>
    %c0_15 = arith.constant 0 : index
    %c0_16 = arith.constant 0 : index
    %39 = vector.load %arg12[%c0_15, %c0_16] : memref<8x128xf32, #tpu.memory_space<vmem>>, vector<8x128xf32>
    tpu.vector_store %arg12[%c0_15, %c0_16], %38 {strides = array<i32>} : memref<8x128xf32, #tpu.memory_space<vmem>>, vector<8x128xf32>,
    %c0_17 = arith.constant 0 : index
    %c0_18 = arith.constant 0 : index
    %c0_19 = arith.constant 0 : index
    %40 = vector.load %arg2[%c0_17, %c0_18, %c0_19] : memref<8x8x8xf32, #tpu.memory_space<vmem>>, vector<8x8x8xf32>
    %41 = vector.shape_cast %40 : vector<8x8x8xf32> to vector<64x8xf32>
    %c0_20 = arith.constant 0 : index
    %c0_21 = arith.constant 0 : index
    %42 = vector.load %arg7[%c0_20, %c0_21] : memref<8x384xf32, #tpu.memory_space<vmem>>, vector<8x384xf32>
    %cst_22 = arith.constant dense<0.000000e+00> : vector<64x384xf32>
    %43 = tpu.matmul %41, %42, %cst_22 {dimension_numbers = #tpu.dot_dimension_numbers<[1], [0], [0], [1], [0, 0, 1, 1], [], []>} : vector<64x8xf32>, vector<8x384xf32>, vector<64x384xf32> -> vector<64x384xf32>
    %44 = vector.broadcast %2 : vector<1x384xf32> to vector<64x384xf32>
    %45 = arith.addf %43, %44 : vector<64x384xf32>
    %46 = vector.extract_strided_slice %45 {offsets = [0, 0], sizes = [64, 128], strides = [1, 1]} : vector<64x384xf32> to vector<64x128xf32>
    %47 = vector.shape_cast %46 : vector<64x128xf32> to vector<8x8x128xf32>
    %48 = vector.extract_strided_slice %45 {offsets = [0, 128], sizes = [64, 128], strides = [1, 1]} : vector<64x384xf32> to vector<64x128xf32>
    %49 = vector.shape_cast %48 : vector<64x128xf32> to vector<8x8x128xf32>
    %50 = vector.extract_strided_slice %45 {offsets = [0, 256], sizes = [64, 128], strides = [1, 1]} : vector<64x384xf32> to vector<64x128xf32>
    %51 = vector.shape_cast %50 : vector<64x128xf32> to vector<8x8x128xf32>
    %c0_23 = arith.constant 0 : index
    %c0_24 = arith.constant 0 : index
    %52 = vector.load %arg9[%c0_23, %c0_24] : memref<2x128xf32, #tpu.memory_space<vmem>>, vector<1x128xf32>
    %c1 = arith.constant 1 : index
    %c0_25 = arith.constant 0 : index
    %53 = vector.load %arg9[%c1, %c0_25] : memref<2x128xf32, #tpu.memory_space<vmem>>, vector<1x128xf32>
    %c0_26 = arith.constant 0 : index
    %c0_27 = arith.constant 0 : index
    %54 = vector.load %arg8[%c0_26, %c0_27] : memref<128x256xf32, #tpu.memory_space<vmem>>, vector<128x128xf32>
    %cst_28 = arith.constant dense<0.000000e+00> : vector<8x128xf32>
    %55 = tpu.matmul %38, %54, %cst_28 {dimension_numbers = #tpu.dot_dimension_numbers<[1], [0], [0], [1], [0, 0, 1, 1], [], []>} : vector<8x128xf32>, vector<128x128xf32>, vector<8x128xf32> -> vector<8x128xf32>
    %56 = vector.shape_cast %55 : vector<8x128xf32> to vector<8x1x128xf32>
    %57 = vector.broadcast %56 : vector<8x1x128xf32> to vector<8x8x128xf32>
    %58 = arith.addf %49, %57 : vector<8x8x128xf32>
    %59 = math.tanh %58 : vector<8x8x128xf32>
    %60 = vector.shape_cast %52 : vector<1x128xf32> to vector<1x1x128xf32>
    %61 = vector.broadcast %60 : vector<1x1x128xf32> to vector<8x8x128xf32>
    %62 = arith.mulf %59, %61 : vector<8x8x128xf32>
    %cst_29 = arith.constant dense<0.000000e+00> : vector<8x8xf32>
    %63 = vector.multi_reduction <add>, %62, %cst_29 [2] : vector<8x8x128xf32> to vector<8x8xf32>
    %cst_30 = arith.constant dense<0xFF800000> : vector<8xf32>
    %64 = vector.multi_reduction <maximumf>, %63, %cst_30 [1] : vector<8x8xf32> to vector<8xf32>
    %65 = vector.shape_cast %64 : vector<8xf32> to vector<8x1xf32>
    %66 = vector.broadcast %65 : vector<8x1xf32> to vector<8x8xf32>
    %67 = arith.subf %63, %66 : vector<8x8xf32>
    %68 = math.exp %67 : vector<8x8xf32>
    %cst_31 = arith.constant dense<0.000000e+00> : vector<8xf32>
    %69 = vector.multi_reduction <add>, %68, %cst_31 [1] : vector<8x8xf32> to vector<8xf32>
    %70 = vector.shape_cast %69 : vector<8xf32> to vector<8x1xf32>
    %71 = tpu.reciprocal %70 {approx = true} : vector<8x1xf32> -> vector<8x1xf32>
    %72 = vector.broadcast %71 : vector<8x1xf32> to vector<8x8xf32>
    %73 = arith.mulf %68, %72 : vector<8x8xf32>
    %74 = vector.shape_cast %73 : vector<8x8xf32> to vector<8x1x8xf32>
    "tpu.trace_start"() <{level = 10 : i32, message = "bqn,bnh->bqh"}> : () -> ()
    %cst_32 = arith.constant dense<0.000000e+00> : vector<8x1x128xf32>
    %75 = tpu.matmul %74, %47, %cst_32 {dimension_numbers = #tpu.dot_dimension_numbers<[2], [1], [1], [2], [0, 0, 0, 1, 1, 2], [0], [0]>} : vector<8x1x8xf32>, vector<8x8x128xf32>, vector<8x1x128xf32> -> vector<8x1x128xf32>
    "tpu.trace_stop"() : () -> ()
    %76 = vector.shape_cast %75 : vector<8x1x128xf32> to vector<8x128xf32>
    %c0_33 = arith.constant 0 : index
    %c128 = arith.constant 128 : index
    %77 = vector.load %arg8[%c0_33, %c128] : memref<128x256xf32, #tpu.memory_space<vmem>>, vector<128x128xf32>
    %cst_34 = arith.constant dense<0.000000e+00> : vector<8x128xf32>
    %78 = tpu.matmul %76, %77, %cst_34 {dimension_numbers = #tpu.dot_dimension_numbers<[1], [0], [0], [1], [0, 0, 1, 1], [], []>} : vector<8x128xf32>, vector<128x128xf32>, vector<8x128xf32> -> vector<8x128xf32>
    %79 = vector.shape_cast %78 : vector<8x128xf32> to vector<8x1x128xf32>
    %80 = vector.broadcast %79 : vector<8x1x128xf32> to vector<8x8x128xf32>
    %81 = arith.addf %51, %80 : vector<8x8x128xf32>
    %82 = math.tanh %81 : vector<8x8x128xf32>
    %83 = vector.shape_cast %53 : vector<1x128xf32> to vector<1x1x128xf32>
    %84 = vector.broadcast %83 : vector<1x1x128xf32> to vector<8x8x128xf32>
    %85 = arith.mulf %82, %84 : vector<8x8x128xf32>
    %cst_35 = arith.constant dense<0.000000e+00> : vector<8x8xf32>
    %86 = vector.multi_reduction <add>, %85, %cst_35 [2] : vector<8x8x128xf32> to vector<8x8xf32>
    %c0_36 = arith.constant 0 : index
    %c0_37 = arith.constant 0 : index
    %87 = vector.load %arg3[%c0_36, %c0_37] : memref<8x8xf32, #tpu.memory_space<vmem>>, vector<8x8xf32>
    %cst_38 = arith.constant 0.000000e+00 : f32
    %88 = vector.broadcast %cst_38 : f32 to vector<8x8xf32>
    %89 = arith.cmpf ogt, %87, %88 : vector<8x8xf32>
    %cst_39 = arith.constant -1.000000e+30 : f32
    %90 = vector.broadcast %cst_39 : f32 to vector<8x8xf32>
    %91 = arith.select %89, %86, %90 : vector<8x8xi1>, vector<8x8xf32>
    %cst_40 = arith.constant -1.000000e+30 : f32
    %92 = vector.broadcast %cst_40 : f32 to vector<8x120xf32>
    %93 = tpu.concatenate %91, %92 in 1 : vector<8x8xf32>, vector<8x120xf32> -> vector<8x128xf32>
    %cst_41 = arith.constant dense<0xFF800000> : vector<8xf32>
    %94 = vector.multi_reduction <maximumf>, %93, %cst_41 [1] : vector<8x128xf32> to vector<8xf32>
    %95 = vector.shape_cast %94 : vector<8xf32> to vector<8x1xf32>
    %96 = vector.broadcast %95 : vector<8x1xf32> to vector<8x128xf32>
    %97 = arith.subf %93, %96 : vector<8x128xf32>
    %98 = math.exp %97 : vector<8x128xf32>
    %cst_42 = arith.constant dense<0.000000e+00> : vector<8xf32>
    %99 = vector.multi_reduction <add>, %98, %cst_42 [1] : vector<8x128xf32> to vector<8xf32>
    %100 = vector.shape_cast %99 : vector<8xf32> to vector<8x1xf32>
    %101 = tpu.reciprocal %100 {approx = true} : vector<8x1xf32> -> vector<8x1xf32>
    %102 = vector.broadcast %101 : vector<8x1xf32> to vector<8x128xf32>
    %103 = arith.mulf %98, %102 : vector<8x128xf32>
    %c0_43 = arith.constant 0 : index
    %c0_44 = arith.constant 0 : index
    %104 = vector.load %arg11[%c0_43, %c0_44] : memref<8x128xf32, #tpu.memory_space<vmem>>, vector<8x128xf32>
    tpu.vector_store %arg11[%c0_43, %c0_44], %103 {strides = array<i32>} : memref<8x128xf32, #tpu.memory_space<vmem>>, vector<8x128xf32>,
    return
  }
  func.func @transform_0(%arg0: i32) -> (i32, i32) {
    %c0_i32 = arith.constant 0 : i32
    %c0_i32_0 = arith.constant 0 : i32
    return %arg0, %c0_i32 : i32, i32
  }
  func.func @transform_1(%arg0: i32) -> (i32, i32, i32) {
    %c0_i32 = arith.constant 0 : i32
    %c0_i32_0 = arith.constant 0 : i32
    %c0_i32_1 = arith.constant 0 : i32
    return %arg0, %c0_i32, %c0_i32_0 : i32, i32, i32
  }
  func.func @transform_2(%arg0: i32) -> (i32, i32) {
    %c0_i32 = arith.constant 0 : i32
    %c0_i32_0 = arith.constant 0 : i32
    return %arg0, %c0_i32 : i32, i32
  }
  func.func @transform_3(%arg0: i32) -> (i32, i32) {
    %c0_i32 = arith.constant 0 : i32
    %c0_i32_0 = arith.constant 0 : i32
    return %arg0, %c0_i32 : i32, i32
  }
  func.func @transform_4(%arg0: i32) -> (i32, i32) {
    %c0_i32 = arith.constant 0 : i32
    %c0_i32_0 = arith.constant 0 : i32
    %c0_i32_1 = arith.constant 0 : i32
    return %c0_i32, %c0_i32_0 : i32, i32
  }
  func.func @transform_5(%arg0: i32) -> (i32, i32) {
    %c0_i32 = arith.constant 0 : i32
    %c0_i32_0 = arith.constant 0 : i32
    %c0_i32_1 = arith.constant 0 : i32
    return %c0_i32, %c0_i32_0 : i32, i32
  }
  func.func @transform_6(%arg0: i32) -> (i32, i32) {
    %c0_i32 = arith.constant 0 : i32
    %c0_i32_0 = arith.constant 0 : i32
    %c0_i32_1 = arith.constant 0 : i32
    return %c0_i32, %c0_i32_0 : i32, i32
  }
  func.func @transform_7(%arg0: i32) -> (i32, i32) {
    %c0_i32 = arith.constant 0 : i32
    %c0_i32_0 = arith.constant 0 : i32
    %c0_i32_1 = arith.constant 0 : i32
    return %c0_i32, %c0_i32_0 : i32, i32
  }
  func.func @transform_8(%arg0: i32) -> (i32, i32) {
    %c0_i32 = arith.constant 0 : i32
    %c0_i32_0 = arith.constant 0 : i32
    %c0_i32_1 = arith.constant 0 : i32
    return %c0_i32, %c0_i32_0 : i32, i32
  }
  func.func @transform_9(%arg0: i32) -> (i32, i32) {
    %c0_i32 = arith.constant 0 : i32
    %c0_i32_0 = arith.constant 0 : i32
    %c0_i32_1 = arith.constant 0 : i32
    return %c0_i32, %c0_i32_0 : i32, i32
  }
  func.func @transform_10(%arg0: i32) -> (i32, i32) {
    %c0_i32 = arith.constant 0 : i32
    %c0_i32_0 = arith.constant 0 : i32
    return %arg0, %c0_i32 : i32, i32
  }
  func.func @transform_11(%arg0: i32) -> (i32, i32) {
    %c0_i32 = arith.constant 0 : i32
    %c0_i32_0 = arith.constant 0 : i32
    return %arg0, %c0_i32 : i32, i32
  }
}

</mosaic_0001>

<bundles_post_ra>
// kernel: tpu_custom_call.1
= control target key start
LH: loop header
LB: loop body
LE: loop exit
PB: predicated region body
PF: predicated region fallthrough
CT: control target
= control target key end

     0   :  { %17 = vsyncpa [#allocation3], 0  ;;  %s3538_s0 = inlined_call_operand.hbm [shape: f32[8,136], index: 0, kind: input, shape index: {}]   ;;  %s3539_s1 = inlined_call_operand.hbm [shape: f32[8,8,8], index: 1, kind: input, shape index: {}]   ;;  %s3540_s2 = inlined_call_operand.hbm [shape: f32[8,8], index: 2, kind: input, shape index: {}]   ;;  %s3541_s3 = inlined_call_operand.vmem [shape: f32[8,128], index: 3, kind: input, shape index: {}]   ;;  %s3542_s4 = inlined_call_operand.hbm [shape: f32[136,384], index: 4, kind: input, shape index: {}]   ;;  %s3543_s5 = inlined_call_operand.hbm [shape: f32[128,384], index: 5, kind: input, shape index: {}]   ;;  %s3544_s6 = inlined_call_operand.hbm [shape: f32[8,384], index: 6, kind: input, shape index: {}]   ;;  %s3545_s7 = inlined_call_operand.hbm [shape: f32[128,256], index: 7, kind: input, shape index: {}]   ;;  %s3546_s8 = inlined_call_operand.vmem [shape: f32[2,128], index: 8, kind: input, shape index: {}]   ;;  %s3547_s9 = inlined_call_operand.vmem [shape: f32[1,896], index: 9, kind: input, shape index: {}]   ;;  %s3548_s10 = inlined_call_operand.hbm [shape: f32[8,128], index: 10, kind: output, shape index: {0}]   ;;  %s3549_s11 = inlined_call_operand.hbm [shape: f32[8,128], index: 11, kind: output, shape index: {1}]  }
   0x1   :  { %18 = vsyncpa [#allocation6], 0 }
   0x2   :  { %19 = vsyncpa [#allocation9], 0 }
   0x3   :  { %20 = vsyncpa [#allocation12], 0 }
   0x4   :  { %21 = vsyncpa [#allocation4], 0 }
   0x5   :  { %22 = vsyncpa [#allocation16], 0  ;;  %s3008_s17 = smov [#allocation5]   ;;  %s2798_s21 = scalar_lea.hbm %s3539_s1, 1024 }
   0x6   :  { %s38_s18 = sshll.u32 %s3008_s17, 4  ;;  %p2799_p0 = scmp.ne.s32.totalorder %s3539_s1, %s2798_s21  ;;  %s39_s18 = int_to_ptr.vmem [resolvable:$true] %s38_s18 }
   0x7   :  { %p2802_p1 = scmp.lt.u32.totalorder %s2798_s21, %s3539_s1 }
   0x9   :  { %p2804_p2 = pnand %p2802_p1, %p2799_p0 }
   0xb   :  { %2807 = shalt.err (!%p2804_p2)
}
   0xc   :  { %s2808_s26 = scalar_lea.vmem %s39_s18, 1024  ;;  %p2813_p4 = scmp.lt.s32.totalorder %s39_s18, %s39_s18 }
   0xd   :  { %p2809_p3 = scmp.ne.s32.totalorder %s39_s18, %s2808_s26  ;;  %p2814_p5 = scmp.lt.s32.totalorder %s2808_s26, %s2808_s26 }
   0xf   :  { %p2815_p6 = por %p2814_p5, %p2813_p4 }
  0x11   :  { %p2816_p7 = pnand %p2815_p6, %p2809_p3 }
  0x13   :  { %2819 = shalt.err (!%p2816_p7)
}
  0x14   :  { %s3009_s27 = smov 128   ;;  %s3010_s28 = smov 8  }
  0x15   :  { %44 = dma.hbm_to_vmem [thread:$0]  %s3539_s1, 1024, %s39_s18, [#allocation6], %s3009_s27, %s3009_s27, %s3010_s28  }
  0x16   :  { %s3011_s12 = smov [#allocation8]   ;;  %s2820_s16 = scalar_lea.hbm %s3542_s4, 6528 }
  0x17   :  { %s62_s13 = sshll.u32 %s3011_s12, 4  ;;  %p2821_p8 = scmp.ne.s32.totalorder %s3542_s4, %s2820_s16  ;;  %s63_s13 = int_to_ptr.vmem [resolvable:$true] %s62_s13 }
  0x18   :  { %p2824_p9 = scmp.lt.u32.totalorder %s2820_s16, %s3542_s4 }
  0x1a   :  { %p2826_p10 = pnand %p2824_p9, %p2821_p8 }
  0x1c   :  { %2829 = shalt.err (!%p2826_p10)
}
  0x1d   :  { %s2830_s22 = scalar_lea.vmem %s63_s13, 6528  ;;  %p2835_p12 = scmp.lt.s32.totalorder %s63_s13, %s63_s13 }
  0x1e   :  { %p2831_p11 = scmp.ne.s32.totalorder %s63_s13, %s2830_s22  ;;  %p2836_p13 = scmp.lt.s32.totalorder %s2830_s22, %s2830_s22 }
  0x20   :  { %p2837_p0 = por %p2836_p13, %p2835_p12 }
  0x22   :  { %p2838_p1 = pnand %p2837_p0, %p2831_p11 }
  0x24   :  { %2841 = shalt.err (!%p2838_p1)
}
  0x25   :  { %s3012_s1 = smov 384   ;;  %s3013_s18 = smov 24  }
  0x26   :  { %68 = dma.hbm_to_vmem [thread:$0]  %s3542_s4, 6528, %s63_s13, [#allocation9], %s3012_s1, %s3012_s1, %s3013_s18  }
  0x27   :  { %s3014_s25 = smov [#allocation11]   ;;  %s3015_s27 = smov [#allocation2]  }
  0x28   :  { %s87_s26 = sshll.u32 %s3014_s25, 4  ;;  %s29_s28 = sshll.u32 %s3015_s27, 4  ;;  %s88_s26 = int_to_ptr.vmem [resolvable:$true] %s87_s26  ;;  %s30_s28 = int_to_ptr.vmem [resolvable:$true] %s29_s28 }
  0x29   :  { %s2842_s12 = scalar_lea.hbm %s3544_s6, 384 }
  0x2a   :  { %p2843_p2 = scmp.ne.s32.totalorder %s3544_s6, %s2842_s12  ;;  %p2846_p3 = scmp.lt.u32.totalorder %s2842_s12, %s3544_s6 }
  0x2c   :  { %p2848_p4 = pnand %p2846_p3, %p2843_p2 }
  0x2e   :  { %2851 = shalt.err (!%p2848_p4)
}
  0x2f   :  { %s2852_s4 = scalar_lea.vmem %s88_s26, 384  ;;  %p2857_p6 = scmp.lt.s32.totalorder %s88_s26, %s88_s26 }
  0x30   :  { %p2853_p5 = scmp.ne.s32.totalorder %s88_s26, %s2852_s4  ;;  %p2858_p7 = scmp.lt.s32.totalorder %s2852_s4, %s2852_s4 }
  0x32   :  { %p2859_p8 = por %p2858_p7, %p2857_p6 }
  0x34   :  { %p2860_p9 = pnand %p2859_p8, %p2853_p5 }
  0x36   :  { %2863 = shalt.err (!%p2860_p9)
}
  0x37   :  { %90 = dma.hbm_to_vmem [thread:$0]  %s3544_s6, 384, %s88_s26, [#allocation12]  }
  0x38   :  { %s2864_s22 = scalar_lea.hbm %s3538_s0, 256 }
  0x39   :  { %p2865_p10 = scmp.ne.s32.totalorder %s3538_s0, %s2864_s22  ;;  %p2868_p11 = scmp.lt.u32.totalorder %s2864_s22, %s3538_s0 }
  0x3b   :  { %p2870_p12 = pnand %p2868_p11, %p2865_p10 }
  0x3d   :  { %2873 = shalt.err (!%p2870_p12)
}
  0x3e   :  { %s2874_s29 = scalar_lea.vmem %s30_s28, 256  ;;  %p2879_p0 = scmp.lt.s32.totalorder %s30_s28, %s30_s28 }
  0x3f   :  { %p2875_p13 = scmp.ne.s32.totalorder %s30_s28, %s2874_s29  ;;  %p2880_p1 = scmp.lt.s32.totalorder %s2874_s29, %s2874_s29 }
  0x41   :  { %p2881_p2 = por %p2880_p1, %p2879_p0 }
  0x43   :  { %p2882_p3 = pnand %p2881_p2, %p2875_p13 }
  0x45   :  { %2885 = shalt.err (!%p2882_p3)
}
  0x46   :  { %32 = dma.hbm_to_vmem [thread:$0]  %s3538_s0, 256, %s30_s28, [#allocation3]  }
  0x47   :  { %s3016_s30 = smov [#allocation7]   ;;  %s3017_s14 = smov [#allocation10]  }
  0x48   :  { %s51_s12 = sshll.u32 %s3016_s30, 4  ;;  %s74_s15 = sshll.u32 %s3017_s14, 4  ;;  %s52_s12 = int_to_ptr.vmem [resolvable:$true] %s51_s12  ;;  %s3139_s15 = int_to_ptr.vmem [resolvable:$true] %s74_s15 }
  0x49   :  { %s2886_s4 = scalar_lea.hbm %s3540_s2, 128 }
  0x4a   :  { %p2887_p4 = scmp.ne.s32.totalorder %s3540_s2, %s2886_s4  ;;  %p2890_p5 = scmp.lt.u32.totalorder %s2886_s4, %s3540_s2 }
  0x4c   :  { %p2892_p6 = pnand %p2890_p5, %p2887_p4 }
  0x4e   :  { %2895 = shalt.err (!%p2892_p6)
}
  0x4f   :  { %s2896_s0 = scalar_lea.vmem %s52_s12, 128  ;;  %p2901_p8 = scmp.lt.s32.totalorder %s52_s12, %s52_s12 }
  0x50   :  { %p2897_p7 = scmp.ne.s32.totalorder %s52_s12, %s2896_s0  ;;  %p2902_p9 = scmp.lt.s32.totalorder %s2896_s0, %s2896_s0 }
  0x52   :  { %p2903_p10 = por %p2902_p9, %p2901_p8 }
  0x54   :  { %p2904_p11 = pnand %p2903_p10, %p2897_p7 }
  0x56   :  { %2907 = shalt.err (!%p2904_p11)
}
  0x57   :  { %54 = dma.hbm_to_vmem [thread:$0]  %s3540_s2, 128, %s52_s12, [#allocation6]  }
  0x58   :  { %s2908_s25 = scalar_lea.hbm %s3543_s5, 6144 }
  0x59   :  { %p2909_p12 = scmp.ne.s32.totalorder %s3543_s5, %s2908_s25  ;;  %p2912_p13 = scmp.lt.u32.totalorder %s2908_s25, %s3543_s5 }
  0x5b   :  { %p2914_p0 = pnand %p2912_p13, %p2909_p12 }
  0x5d   :  { %2917 = shalt.err (!%p2914_p0)
}
  0x5e   :  { %s2918_s30 = scalar_lea.vmem %s3139_s15, 6144  ;;  %p2923_p2 = scmp.lt.s32.totalorder %s3139_s15, %s3139_s15 }
  0x5f   :  { %p2919_p1 = scmp.ne.s32.totalorder %s3139_s15, %s2918_s30  ;;  %p2924_p3 = scmp.lt.s32.totalorder %s2918_s30, %s2918_s30 }
  0x61   :  { %p2925_p4 = por %p2924_p3, %p2923_p2 }
  0x63   :  { %p2926_p5 = pnand %p2925_p4, %p2919_p1 }
  0x65   :  { %2929 = shalt.err (!%p2926_p5)
}
  0x66   :  { %80 = dma.hbm_to_vmem [thread:$0]  %s3543_s5, 6144, %s3139_s15, [#allocation9], %s3012_s1, %s3012_s1, %s3013_s18  }
  0x67   :  { %s3018_s14 = smov [#allocation13]   ;;  %s2930_s13 = scalar_lea.hbm %s3545_s7, 4096 }
  0x68   :  { %s96_s16 = sshll.u32 %s3018_s14, 4  ;;  %p2931_p6 = scmp.ne.s32.totalorder %s3545_s7, %s2930_s13  ;;  %s97_s16 = int_to_ptr.vmem [resolvable:$true] %s96_s16 }
  0x69   :  { %p2934_p7 = scmp.lt.u32.totalorder %s2930_s13, %s3545_s7 }
  0x6b   :  { %p2936_p8 = pnand %p2934_p7, %p2931_p6 }
  0x6d   :  { %2939 = shalt.err (!%p2936_p8)
}
  0x6e   :  { %s2940_s28 = scalar_lea.vmem %s97_s16, 4096  ;;  %p2945_p10 = scmp.lt.s32.totalorder %s97_s16, %s97_s16 }
  0x6f   :  { %p2941_p9 = scmp.ne.s32.totalorder %s97_s16, %s2940_s28  ;;  %p2946_p11 = scmp.lt.s32.totalorder %s2940_s28, %s2940_s28 }
  0x71   :  { %p2947_p12 = por %p2946_p11, %p2945_p10 }
  0x73   :  { %p2948_p13 = pnand %p2947_p12, %p2941_p9 }
  0x75   :  { %2951 = shalt.err (!%p2948_p13)
}
  0x76   :  { %s3019_s5 = smov 256   ;;  %s3020_s1 = smov 16  }
  0x77   :  { %102 = dma.hbm_to_vmem [thread:$0]  %s3545_s7, 4096, %s97_s16, [#allocation12], %s3019_s5, %s3019_s5, %s3020_s1  }
  0x78   :  { %2996 = dma.done.wait [#allocation3], 256  }
  0x79   :  { %2997 = vsyncadd [#allocation3], 4294967040 }
  0x7a   :  { %2998 = dma.done.wait [#allocation6], 1152  }
  0x7b   :  { %2999 = vsyncadd [#allocation6], 4294966144 }
  0x7c   :  { %3000 = dma.done.wait [#allocation9], 12672  }
  0x7d   :  { %3001 = vsyncadd [#allocation9], 4294954624 }
  0x7e   :  { %3002 = dma.done.wait [#allocation12], 4480  }
  0x7f   :  { %3003 = vsyncadd [#allocation12], 4294962816  ;;  %v3021_v0 = vmov 0.0|0.0   ;;  %v135_v1 = vld [vmem:[#allocation8 + $0x8] sm:$0xff]  ;;  %v138_v2 = vld [vmem:[#allocation8 + $0x20] sm:$0xff]  ;;  %vm201_vm0 = vcmask 64512  }
  0x80   :  { %2580 = vmatprep.subr.bf16.mxu1 %v3021_v0  ;;  %v134_v3 = vld [vmem:[#allocation8] sm:$0xff]  ;;  %v2548_v4 = vpack.c.bf16 %v138_v2, %v135_v1  ;;  %v137_v5 = vld [vmem:[#allocation8 + $0x18] sm:$0xff]  ;;  %v144_v7 = vld [vmem:[#allocation8 + $0x50] sm:$0xff]  ;;  %vm3023_vm1 = vmmov 0   ;;  %vm1097_vm2 = vcmask 1041409   ;;  %vm1099_vm3 = vcmask 1042434  }
  0x81   :  { %v141_v6 = vld [vmem:[#allocation8 + $0x38] sm:$0xff]  ;;  %v2550_v8 = vpack.c.bf16 %v137_v5, %v134_v3  ;;  %v140_v10 = vld [vmem:[#allocation8 + $0x30] sm:$0xff]  ;;  %v143_v11 = vld [vmem:[#allocation8 + $0x48] sm:$0xff]  ;;  %vm1101_vm4 = vcmask 1043459   ;;  %vm1103_vm5 = vcmask 1044484   ;;  %vm1105_vm6 = vcmask 1045509  }
  0x82   :  { %v2552_v9 = vpack.c.bf16 %v144_v7, %v141_v6  ;;  %v147_v12 = vld [vmem:[#allocation8 + $0x68] sm:$0xff]  ;;  %2549 = vmatprep.subr.bf16.mxu0 %v2548_v4  ;;  %v150_v13 = vld [vmem:[#allocation8 + $0x80] sm:$0xff]  ;;  %v2554_v14 = vpack.c.bf16 %v143_v11, %v140_v10  ;;  %v149_v17 = vld [vmem:[#allocation8 + $0x78] sm:$0xff]  ;;  %vm1107_vm7 = vcmask 1046534   ;;  %vm1109_vm8 = vcmask 1047559  }
  0x83   :  { %2551 = vmatpush1.bf16.msra.mxu0 %v2550_v8  ;;  %v2556_v15 = vpack.c.bf16 %v150_v13, %v147_v12  ;;  %v146_v16 = vld [vmem:[#allocation8 + $0x60] sm:$0xff]  ;;  %v153_v18 = vld [vmem:[#allocation8 + $0x98] sm:$0xff]  ;;  %v156_v19 = vld [vmem:[#allocation8 + $0xb0] sm:$0xff] }
  0x84   :  { %2553 = vmatprep.subr.bf16.mxu0 %v2552_v9  ;;  %v2558_v20 = vpack.c.bf16 %v149_v17, %v146_v16  ;;  %v152_v21 = vld [vmem:[#allocation8 + $0x90] sm:$0xff]  ;;  %v2560_v22 = vpack.c.bf16 %v156_v19, %v153_v18  ;;  %v155_v23 = vld [vmem:[#allocation8 + $0xa8] sm:$0xff]  ;;  %v162_v27 = vld [vmem:[#allocation8 + $0xe0] sm:$0xff] }
  0x85   :  { %v136_v24 = vld [vmem:[#allocation8 + $0x10] sm:$0xff]  ;;  %v139_v25 = vld [vmem:[#allocation8 + $0x28] sm:$0xff]  ;;  %v142_v29 = vld [vmem:[#allocation8 + $0x40] sm:$0xff]  ;;  %v2562_v31 = vpack.c.bf16 %v155_v23, %v152_v21 }
  0x86   :  { %v159_v26 = vld [vmem:[#allocation8 + $0xc8] sm:$0xff]  ;;  %v2581_v28 = vpack.c.bf16 %v139_v25, %v136_v24  ;;  %v145_v30 = vld [vmem:[#allocation8 + $0x58] sm:$0xff]  ;;  %v158_v32 = vld [vmem:[#allocation8 + $0xc0] sm:$0xff] }
  0x87   :  { %2555 = vmatpush1.bf16.msra.mxu0 %v2554_v14  ;;  %v2584_v33 = vpack.c.bf16 %v145_v30, %v142_v29  ;;  %v133_v34 = vld [vmem:[#allocation2 + $0x8] sm:$0xff]  ;;  %v2564_v35 = vpack.c.bf16 %v162_v27, %v159_v26  ;;  %v161_v36 = vld [vmem:[#allocation8 + $0xd8] sm:$0xff]  ;;  %v151_v38 = vld [vmem:[#allocation8 + $0x88] sm:$0xff] }
  0x88   :  { %2557 = vmatprep.subr.bf16.mxu0 %v2556_v15  ;;  %2582 = vmatpush1.bf16.msra.mxu1 %v2581_v28  ;;  %v148_v37 = vld [vmem:[#allocation8 + $0x70] sm:$0xff]  ;;  %v165_v39 = vld [vmem:[#allocation8 + $0xf8] sm:$0xff]  ;;  %v2566_v41 = vpack.c.bf16 %v161_v36, %v158_v32  ;;  %v167_v45 = vld [vmem:[#allocation8 + $0x108] sm:$0xff] }
  0x89   :  { %2583 = vmatprep.subr.bf16.mxu1 %v3021_v0  ;;  %v168_v40 = vld [vmem:[#allocation8 + $0x110] sm:$0xff]  ;;  %2282 = vmatprep.mubr.msk.f32.mxu0 %vm201_vm0, %v133_v34  ;;  %v2587_v43 = vpack.c.bf16 %v151_v38, %v148_v37  ;;  %v154_v46 = vld [vmem:[#allocation8 + $0xa0] sm:$0xff]  ;;  %v157_v47 = vld [vmem:[#allocation8 + $0xb8] sm:$0xff] }
  0x8a   :  { %2283 = vmatprep.mubr.msk.f32.mxu1 %vm201_vm0, %v133_v34  ;;  %v164_v42 = vld [vmem:[#allocation8 + $0xf0] sm:$0xff]  ;;  %v2568_v44 = vpack.c.bf16 %v168_v40, %v165_v39  ;;  %v171_v48 = vld [vmem:[#allocation8 + $0x128] sm:$0xff]  ;;  %v174_v49 = vld [vmem:[#allocation8 + $0x140] sm:$0xff]  ;;  %v2590_v52 = vpack.c.bf16 %v157_v47, %v154_v46 }
  0x8b   :  { %2559 = vmatpush1.bf16.msra.mxu0 %v2558_v20  ;;  %v2570_v50 = vpack.c.bf16 %v167_v45, %v164_v42  ;;  %v170_v51 = vld [vmem:[#allocation8 + $0x120] sm:$0xff]  ;;  %v2572_v53 = vpack.c.bf16 %v174_v49, %v171_v48  ;;  %v173_v54 = vld [vmem:[#allocation8 + $0x138] sm:$0xff]  ;;  %v160_v55 = vld [vmem:[#allocation8 + $0xd0] sm:$0xff] }
  0x8c   :  { %2561 = vmatprep.subr.bf16.mxu0 %v2560_v22  ;;  %2585 = vmatpush1.bf16.msra.mxu1 %v2584_v33  ;;  %v163_v56 = vld [vmem:[#allocation8 + $0xe8] sm:$0xff]  ;;  %v177_v57 = vld [vmem:[#allocation8 + $0x158] sm:$0xff]  ;;  %v180_v58 = vld [vmem:[#allocation8 + $0x170] sm:$0xff]  ;;  %v2574_v59 = vpack.c.bf16 %v173_v54, %v170_v51  ;;  %v3022_v33 = vmov 0.0  }
  0x8d   :  { %2586 = vmatprep.subr.bf16.mxu1 %v3021_v0  ;;  %v176_v60 = vld [vmem:[#allocation8 + $0x150] sm:$0xff]  ;;  %v2593_v61 = vpack.c.bf16 %v163_v56, %v160_v55  ;;  %v2576_v62 = vpack.c.bf16 %v180_v58, %v177_v57  ;;  %v179_v63 = vld [vmem:[#allocation8 + $0x168] sm:$0xff]  ;;  %v166_v1 = vld [vmem:[#allocation8 + $0x100] sm:$0xff] }
  0x8e   :  { %v169_v2 = vld [vmem:[#allocation8 + $0x118] sm:$0xff]  ;;  %v2578_v3 = vpack.c.bf16 %v179_v63, %v176_v60  ;;  %v172_v5 = vld [vmem:[#allocation8 + $0x130] sm:$0xff]  ;;  %v175_v6 = vld [vmem:[#allocation8 + $0x148] sm:$0xff] }
  0x8f   :  { %2563 = vmatpush1.bf16.msra.mxu0 %v2562_v31  ;;  %v2596_v4 = vpack.c.bf16 %v169_v2, %v166_v1  ;;  %v183_v7 = vld [vmem:[#allocation8 + $0x188] sm:$0xff]  ;;  %v347_v8 = vld [vmem:[#allocation10 + $0x8] sm:$0xff]  ;;  %v350_v9 = vld [vmem:[#allocation10 + $0x20] sm:$0xff]  ;;  %v2599_v14 = vpack.c.bf16 %v175_v6, %v172_v5 }
  0x90   :  { %2565 = vmatprep.subr.bf16.mxu0 %v2564_v35  ;;  %2588 = vmatpush1.bf16.msra.mxu1 %v2587_v43  ;;  %v346_v10 = vld [vmem:[#allocation10] sm:$0xff]  ;;  %v349_v11 = vld [vmem:[#allocation10 + $0x18] sm:$0xff]  ;;  %v356_v13 = vld [vmem:[#allocation10 + $0x50] sm:$0xff]  ;;  %v2604_v16 = vpack.c.bf16 %v350_v9, %v347_v8 }
  0x91   :  { %2589 = vmatprep.subr.bf16.mxu1 %v3021_v0  ;;  %v353_v12 = vld [vmem:[#allocation10 + $0x38] sm:$0xff]  ;;  %v182_v15 = vld [vmem:[#allocation8 + $0x180] sm:$0xff]  ;;  %v181_v18 = vld [vmem:[#allocation8 + $0x178] sm:$0xff]  ;;  %v2606_v20 = vpack.c.bf16 %v349_v11, %v346_v10 }
  0x92   :  { %v178_v17 = vld [vmem:[#allocation8 + $0x160] sm:$0xff]  ;;  %v132_v19 = vld [vmem:[#allocation2] sm:$0xff]  ;;  %v2608_v21 = vpack.c.bf16 %v356_v13, %v353_v12  ;;  %v362_v25 = vld [vmem:[#allocation10 + $0x80] sm:$0xff] }
  0x93   :  { %2567 = vmatpush1.bf16.msra.mxu0 %v2566_v41  ;;  %v352_v22 = vld [vmem:[#allocation10 + $0x30] sm:$0xff]  ;;  %v355_v23 = vld [vmem:[#allocation10 + $0x48] sm:$0xff]  ;;  %v2602_v26 = vpack.c.bf16 %v181_v18, %v178_v17  ;;  %v358_v28 = vld [vmem:[#allocation10 + $0x60] sm:$0xff] }
  0x94   :  { %2569 = vmatprep.subr.bf16.mxu0 %v2568_v44  ;;  %2591 = vmatpush1.bf16.msra.mxu1 %v2590_v52  ;;  %v359_v24 = vld [vmem:[#allocation10 + $0x68] sm:$0xff]  ;;  %v2610_v27 = vpack.c.bf16 %v355_v23, %v352_v22  ;;  %v361_v30 = vld [vmem:[#allocation10 + $0x78] sm:$0xff]  ;;  %v348_v31 = vld [vmem:[#allocation10 + $0x10] sm:$0xff] }
  0x95   :  { %2592 = vmatprep.subr.bf16.mxu1 %v3021_v0  ;;  %v2612_v29 = vpack.c.bf16 %v362_v25, %v359_v24  ;;  %v351_v32 = vld [vmem:[#allocation10 + $0x28] sm:$0xff]  ;;  %v365_v34 = vld [vmem:[#allocation10 + $0x98] sm:$0xff]  ;;  %v368_v35 = vld [vmem:[#allocation10 + $0xb0] sm:$0xff]  ;;  %v2614_v37 = vpack.c.bf16 %v361_v30, %v358_v28 }
  0x96   :  { %v184_v36 = vld [vmem:[#allocation8 + $0x190] sm:$0xff]  ;;  %v364_v38 = vld [vmem:[#allocation10 + $0x90] sm:$0xff]  ;;  %v2637_v39 = vpack.c.bf16 %v351_v32, %v348_v31  ;;  %v2616_v40 = vpack.c.bf16 %v368_v35, %v365_v34  ;;  %v367_v41 = vld [vmem:[#allocation10 + $0xa8] sm:$0xff] }
  0x97   :  { %2571 = vmatpush1.bf16.msra.mxu0 %v2570_v50  ;;  %v354_v42 = vld [vmem:[#allocation10 + $0x40] sm:$0xff]  ;;  %v357_v43 = vld [vmem:[#allocation10 + $0x58] sm:$0xff]  ;;  %v371_v44 = vld [vmem:[#allocation10 + $0xc8] sm:$0xff]  ;;  %v2618_v46 = vpack.c.bf16 %v367_v41, %v364_v38 }
  0x98   :  { %2573 = vmatprep.subr.bf16.mxu0 %v2572_v53  ;;  %2594 = vmatpush1.bf16.msra.mxu1 %v2593_v61  ;;  %v374_v45 = vld [vmem:[#allocation10 + $0xe0] sm:$0xff]  ;;  %v2640_v48 = vpack.c.bf16 %v357_v43, %v354_v42  ;;  %v373_v50 = vld [vmem:[#allocation10 + $0xd8] sm:$0xff]  ;;  %v360_v51 = vld [vmem:[#allocation10 + $0x70] sm:$0xff] }
  0x99   :  { %2595 = vmatprep.subr.bf16.mxu1 %v3021_v0  ;;  %v370_v47 = vld [vmem:[#allocation10 + $0xc0] sm:$0xff]  ;;  %v2620_v49 = vpack.c.bf16 %v374_v45, %v371_v44  ;;  %v363_v52 = vld [vmem:[#allocation10 + $0x88] sm:$0xff]  ;;  %v377_v53 = vld [vmem:[#allocation10 + $0xf8] sm:$0xff] }
  0x9a   :  { %v380_v54 = vld [vmem:[#allocation10 + $0x110] sm:$0xff]  ;;  %v2622_v55 = vpack.c.bf16 %v373_v50, %v370_v47  ;;  %v2643_v57 = vpack.c.bf16 %v363_v52, %v360_v51  ;;  %v366_v60 = vld [vmem:[#allocation10 + $0xa0] sm:$0xff]  ;;  %v369_v61 = vld [vmem:[#allocation10 + $0xb8] sm:$0xff] }
  0x9b   :  { %2575 = vmatpush1.bf16.msra.mxu0 %v2574_v59  ;;  %v376_v56 = vld [vmem:[#allocation10 + $0xf0] sm:$0xff]  ;;  %v2624_v58 = vpack.c.bf16 %v380_v54, %v377_v53  ;;  %v379_v59 = vld [vmem:[#allocation10 + $0x108] sm:$0xff]  ;;  %v386_v63 = vld [vmem:[#allocation10 + $0x140] sm:$0xff] }
  0x9c   :  { %2577 = vmatprep.subr.bf16.mxu0 %v2576_v62  ;;  %2597 = vmatpush1.bf16.msra.mxu1 %v2596_v4  ;;  %v383_v62 = vld [vmem:[#allocation10 + $0x128] sm:$0xff]  ;;  %v2626_v1 = vpack.c.bf16 %v379_v59, %v376_v56  ;;  %v382_v2 = vld [vmem:[#allocation10 + $0x120] sm:$0xff]  ;;  %v385_v5 = vld [vmem:[#allocation10 + $0x138] sm:$0xff] }
  0x9d   :  { %2598 = vmatprep.subr.bf16.mxu1 %v3021_v0  ;;  %v2628_v4 = vpack.c.bf16 %v386_v63, %v383_v62  ;;  %v372_v6 = vld [vmem:[#allocation10 + $0xd0] sm:$0xff]  ;;  %v389_v8 = vld [vmem:[#allocation10 + $0x158] sm:$0xff]  ;;  %v2630_v10 = vpack.c.bf16 %v385_v5, %v382_v2  ;;  %v390_v23 = vld [vmem:[#allocation10 + $0x160] sm:$0xff] }
  0x9e   :  { %v392_v9 = vld [vmem:[#allocation10 + $0x170] sm:$0xff]  ;;  %v393_v24 = vld [vmem:[#allocation10 + $0x178] sm:$0xff]  ;;  %v564_v28 = vld [vmem:[#allocation5] sm:$0xff] }
  0x9f   :  { %2579 = vmatpush1.bf16.msra.mxu0 %v2578_v3  ;;  %v2646_v3 = vpack.c.bf16 %v369_v61, %v366_v60  ;;  %v388_v11 = vld [vmem:[#allocation10 + $0x150] sm:$0xff]  ;;  %v2632_v13 = vpack.c.bf16 %v392_v9, %v389_v8  ;;  %v2658_v25 = vpack.c.bf16 %v393_v24, %v390_v23  ;;  %v836_v30 = vld [vmem:[#allocation13 + $0x10] sm:$0xff]  ;;  %v837_v34 = vld [vmem:[#allocation13 + $0x20] sm:$0xff] }
  0xa0   :  { %237 = vmatprep.subr.mxu0 %v183_v7  ;;  %2600 = vmatpush1.bf16.msra.mxu1 %v2599_v14  ;;  %v375_v7 = vld [vmem:[#allocation10 + $0xe8] sm:$0xff]  ;;  %v839_v38 = vld [vmem:[#allocation13 + $0x40] sm:$0xff]  ;;  %v568_v45 = vld [vmem:[#allocation5 + $0x20] sm:$0xff] }
  0xa1   :  { %2601 = vmatprep.subr.bf16.mxu1 %v3021_v0  ;;  %v2649_v12 = vpack.c.bf16 %v375_v7, %v372_v6  ;;  %v391_v14 = vld [vmem:[#allocation10 + $0x168] sm:$0xff]  ;;  %v567_v41 = vld [vmem:[#allocation5 + $0x18] sm:$0xff]  ;;  %v574_v63 = vld [vmem:[#allocation11 + $0x10] sm:$0xff] }
  0xa2   :  { %v2634_v17 = vpack.c.bf16 %v391_v14, %v388_v11  ;;  %v3219_v32 = vld [vmem:[#allocation5 + $0x8] sm:$0xff]  ;;  %v841_v42 = vld [vmem:[#allocation13 + $0x60] sm:$0xff] }
  0xa3   :  { %238 = vmatpush1.msra.mxu0 %v182_v15  ;;  %v378_v15 = vld [vmem:[#allocation10 + $0x100] sm:$0xff]  ;;  %v838_v35 = vld [vmem:[#allocation13 + $0x30] sm:$0xff]  ;;  %v845_v50 = vld [vmem:[#allocation13 + $0xa0] sm:$0xff] }
  0xa4   :  { %2605 = vmatprep.subr.bf16.mxu0 %v2604_v16  ;;  %270 = vmatmul.mubr.f32.vlgmr.msra.gmra.mrb[0].mxu0 %v132_v19  ;;  %v381_v16 = vld [vmem:[#allocation10 + $0x118] sm:$0xff]  ;;  %v842_v43 = vld [vmem:[#allocation13 + $0x70] sm:$0xff] }
  0xa5   :  { %2607 = vmatpush1.bf16.msra.mxu0 %v2606_v20  ;;  %458 = vmatprep.mubr.f32.mxu0 %v3022_v33  ;;  %v2652_v18 = vpack.c.bf16 %v381_v16, %v378_v15  ;;  %v387_v20 = vld [vmem:[#allocation10 + $0x148] sm:$0xff]  ;;  %v2670_v44 = vpack.c.bf16 %v842_v43, %v841_v42  ;;  %v847_v53 = vld [vmem:[#allocation13 + $0xc0] sm:$0xff] }
  0xa6   :  { %2609 = vmatprep.subr.bf16.mxu0 %v2608_v21  ;;  %2603 = vmatpush1.bf16.msra.mxu1 %v2602_v26  ;;  %v3208_v21 = vld [vmem:[%s3541_s3] sm:$0xff]  ;;  %v573_v26 = vld [vmem:[#allocation11 + $0x8] sm:$0xff]  ;;  %v571_v59 = vld [vmem:[#allocation5 + $0x38] sm:$0xff] }
  0xa7   :  { %308 = vmatprep.subr.mxu1 %v3022_v33  ;;  %v844_v47 = vld [vmem:[#allocation13 + $0x90] sm:$0xff] }
  0xa8   :  { %v846_v51 = vld [vmem:[#allocation13 + $0xb0] sm:$0xff] }
  0xa9   :  { %2611 = vmatpush1.bf16.msra.mxu0 %v2610_v27  ;;  %v572_v27 = vld [vmem:[#allocation11] sm:$0xff]  ;;  %v2676_v52 = vpack.c.bf16 %v846_v51, %v845_v50  ;;  %v848_v54 = vld [vmem:[#allocation13 + $0xd0] sm:$0xff] }
  0xaa   :  { %2613 = vmatprep.subr.bf16.mxu0 %v2612_v29  ;;  %309 = vmatpush1.msra.mxu1 %v184_v36  ;;  %v835_v29 = vld [vmem:[#allocation13] sm:$0xff]  ;;  %v2664_v36 = vpack.c.bf16 %v838_v35, %v837_v34  ;;  %v2679_v56 = vpack.c.bf16 %v848_v54, %v847_v53 }
  0xab   :  { %2636 = vmatprep.subr.bf16.mxu1 %v3021_v0  ;;  %341 = vmatmul.mubr.f32.vlgmr.msra.gmra.mrb[0].mxu1 %v132_v19  ;;  %v384_v19 = vld [vmem:[#allocation10 + $0x130] sm:$0xff]  ;;  %v2661_v31 = vpack.c.bf16 %v836_v30, %v835_v29 }
  0xac   :  { %2638 = vmatpush3.bf16.msra.mxu1 %v2637_v39  ;;  %2421 = vmatprep.mubr.msk.f32.mxu1 %vm3023_vm1, %v3022_v33  ;;  %v2655_v22 = vpack.c.bf16 %v387_v20, %v384_v19  ;;  %v840_v39 = vld [vmem:[#allocation13 + $0x50] sm:$0xff]  ;;  %v2286_v20 = vld [vmem:[%s3547_s9 + $0x3] ss:$0 sm:$0xff] }
  0xad   :  { %2615 = vmatpush1.bf16.msra.mxu0 %v2614_v37  ;;  %2639 = vmatprep.subr.bf16.mxu1 %v3021_v0  ;;  %v566_v37 = vld [vmem:[#allocation5 + $0x10] sm:$0xff] }
  0xae   :  { %2617 = vmatprep.subr.bf16.mxu0 %v2616_v40  ;;  %v2667_v40 = vpack.c.bf16 %v840_v39, %v839_v38 }
  0xb0   :  { %2641 = vmatpush3.bf16.msra.mxu1 %v2640_v48 }
  0xb1   :  { %2619 = vmatpush1.bf16.msra.mxu0 %v2618_v46  ;;  %2642 = vmatprep.subr.bf16.mxu1 %v3021_v0  ;;  %v843_v46 = vld [vmem:[#allocation13 + $0x80] sm:$0xff] }
  0xb2   :  { %2621 = vmatprep.subr.bf16.mxu0 %v2620_v49  ;;  %v2673_v48 = vpack.c.bf16 %v844_v47, %v843_v46  ;;  %v569_v49 = vld [vmem:[#allocation5 + $0x28] sm:$0xff] }
  0xb4   :  { %2644 = vmatpush3.bf16.msra.mxu1 %v2643_v57  ;;  %v849_v57 = vld [vmem:[#allocation13 + $0xe0] sm:$0xff] }
  0xb5   :  { %2623 = vmatpush1.bf16.msra.mxu0 %v2622_v55  ;;  %2645 = vmatprep.subr.bf16.mxu1 %v3021_v0  ;;  %v570_v55 = vld [vmem:[#allocation5 + $0x30] sm:$0xff] }
  0xb6   :  { %2625 = vmatprep.subr.bf16.mxu0 %v2624_v58  ;;  %v850_v58 = vld [vmem:[#allocation13 + $0xf0] sm:$0xff] }
  0xb7   :  { %v2682_v60 = vpack.c.bf16 %v850_v58, %v849_v57 }
  0xb8   :  { %2647 = vmatpush3.bf16.msra.mxu1 %v2646_v3 }
  0xb9   :  { %2627 = vmatpush1.bf16.msra.mxu0 %v2626_v1  ;;  %2648 = vmatprep.subr.bf16.mxu1 %v3021_v0  ;;  %v186_v1 = vlaneseq }
  0xba   :  { %2629 = vmatprep.subr.bf16.mxu0 %v2628_v4  ;;  %v128_v4 = vld [vmem:[%s3547_s9] sm:$0x7] }
  0xbb   :  { %v3250_v2 = vshrl.u32 %v186_v1, 7 }
  0xbc   :  { %2650 = vmatpush3.bf16.msra.mxu1 %v2649_v12 }
  0xbd   :  { %2631 = vmatpush1.bf16.msra.mxu0 %v2630_v10  ;;  %2651 = vmatprep.subr.bf16.mxu1 %v3021_v0  ;;  %v3255_v3 = vsub.s32 0, %v3250_v2  ;;  %v3262_v5 = vsub.s32 1, %v3250_v2 }
  0xbe   :  { %2633 = vmatprep.subr.bf16.mxu0 %v2632_v13 }
  0xbf   :  { %v189_v6 = vrot.slane %v128_v4, %v3255_v3  ;;  %v193_v8 = vrot.slane %v128_v4, %v3262_v5 }
  0xc0   :  { %2653 = vmatpush3.bf16.msra.mxu1 %v2652_v18  ;;  %v3271_v18 = vsub.s32 2, %v3250_v2 }
  0xc1   :  { %2635 = vmatpush1.bf16.msra.mxu0 %v2634_v17  ;;  %2654 = vmatprep.subr.bf16.mxu1 %v3021_v0 }
  0xc2   :  { %615 = vmatprep.subr.mxu0 %v573_v26 }
  0xc4   :  { %459 = vmatmul.mubr.f32.vlgmr.msra.gmra.mrb[0].mxu0 %v3208_v21  ;;  %2656 = vmatpush3.bf16.msra.mxu1 %v2655_v22  ;;  %v197_v22 = vrot.slane %v128_v4, %v3271_v18 }
  0xc5   :  { %679 = vmatprep.mubr.f32.mxu0 %v3022_v33  ;;  %2657 = vmatprep.subr.bf16.mxu1 %v3021_v0 }
  0xc6   :  { %616 = vmatpush1.msra.mxu0 %v572_v27 }
  0xc7   :  { %2660 = vmatprep.subr.bf16.mxu0 %v3021_v0 }
  0xc8   :  { %2659 = vmatpush3.bf16.msra.mxu1 %v2658_v25  ;;  %2287 = vmatmul.mubr.msk.f32.vlgmr.msra.gmra.mrb[2].mxu0 %vm201_vm0, %v564_v28 }
  0xc9   :  { %685 = vmatprep.mubr.f32.mxu0 %v3022_v33  ;;  %2662 = vmatpush3.bf16.msra.mxu0 %v2661_v31 }
  0xca   :  { %2663 = vmatprep.subr.bf16.mxu0 %v3021_v0  ;;  %2424 = vmatprep.subr.mxu1 %v574_v63 }
  0xcb   :  { %2422 = vmatmul.mubr.f32.vlgmr.msra.gmra.mrb[2].mxu1 %v3208_v21 }
  0xcc   :  { %2426 = vmatprep.mubr.msk.f32.mxu1 %vm201_vm0, %v564_v28  ;;  %2288 = vmatmul.mubr.msk.f32.gmra.mrb[4].mxu0 %vm201_vm0, %v3219_v32 }
  0xcd   :  { %691 = vmatprep.mubr.f32.mxu0 %v3022_v33  ;;  %2665 = vmatpush3.bf16.msra.mxu0 %v2664_v36  ;;  %v3283_v36 = vld [vmem:[%s3547_s9 + $0x4] sm:$0x7] }
  0xce   :  { %2666 = vmatprep.subr.bf16.mxu0 %v3021_v0  ;;  %2425 = vmatpush3.msra.mxu1 %v574_v63  ;;  %v583_v38 = vrot.slane %v3283_v36, %v3262_v5 }
  0xcf   :  { %2488 = vmatprep.subr.mxu1 %v3022_v33  ;;  %2427 = vmatmul.mubr.msk.f32.vlgmr.msra.gmra.mrb[4].mxu1 %vm201_vm0, %v3219_v32 }
  0xd0   :  { %2289 = vmatmul.mubr.msk.f32.gmra.mrb[6].mxu0 %vm201_vm0, %v566_v37  ;;  %2429 = vmatprep.mubr.msk.f32.mxu1 %vm201_vm0, %v566_v37  ;;  %v579_v37 = vrot.slane %v3283_v36, %v3255_v3 }
  0xd1   :  { %697 = vmatprep.mubr.f32.mxu0 %v3022_v33  ;;  %2668 = vmatpush3.bf16.msra.mxu0 %v2667_v40 }
  0xd2   :  { %2669 = vmatprep.subr.bf16.mxu0 %v3021_v0 }
  0xd3   :  { %2430 = vmatmul.mubr.msk.f32.gmra.mrb[6].mxu1 %vm201_vm0, %v567_v41 }
  0xd4   :  { %2290 = vmatmul.mubr.msk.f32.gmra.mrb[8].mxu0 %vm201_vm0, %v567_v41  ;;  %2432 = vmatprep.mubr.msk.f32.mxu1 %vm201_vm0, %v568_v45 }
  0xd5   :  { %703 = vmatprep.mubr.f32.mxu0 %v3022_v33  ;;  %2671 = vmatpush3.bf16.msra.mxu0 %v2670_v44 }
  0xd6   :  { %2672 = vmatprep.subr.bf16.mxu0 %v3021_v0 }
  0xd7   :  { %2433 = vmatmul.mubr.msk.f32.gmra.mrb[8].mxu1 %vm201_vm0, %v569_v49 }
  0xd8   :  { %2291 = vmatmul.mubr.msk.f32.gmra.mrb[10].mxu0 %vm201_vm0, %v568_v45  ;;  %2435 = vmatprep.mubr.msk.f32.mxu1 %vm201_vm0, %v570_v55 }
  0xd9   :  { %709 = vmatprep.mubr.f32.mxu0 %v3022_v33  ;;  %2674 = vmatpush3.bf16.msra.mxu0 %v2673_v48 }
  0xda   :  { %2675 = vmatprep.subr.bf16.mxu0 %v3021_v0 }
  0xdb   :  { %2436 = vmatmul.mubr.msk.f32.gmra.mrb[10].mxu1 %vm201_vm0, %v571_v59 }
  0xdc   :  { %2292 = vmatmul.mubr.msk.f32.gmra.mrb[12].mxu0 %vm201_vm0, %v569_v49  ;;  %2490 = vmatprep.mubr.msk.f32.mxu1 %vm3023_vm1, %v3022_v33 }
  0xdd   :  { %715 = vmatprep.mubr.f32.mxu0 %v3022_v33  ;;  %2677 = vmatpush3.bf16.msra.mxu0 %v2676_v52 }
  0xde   :  { %2678 = vmatprep.subr.bf16.mxu0 %v3021_v0 }
  0xe0   :  { %2293 = vmatmul.mubr.msk.f32.gmra.mrb[14].mxu0 %vm201_vm0, %v570_v55 }
  0xe1   :  { %721 = vmatprep.mubr.f32.mxu0 %v3022_v33  ;;  %2680 = vmatpush3.bf16.msra.mxu0 %v2679_v56 }
  0xe2   :  { %2681 = vmatprep.subr.bf16.mxu0 %v3021_v0 }
  0xe4   :  { %2294 = vmatmul.mubr.msk.f32.gmra.mrb[16].mxu0 %vm201_vm0, %v571_v59 }
  0xe5   :  { %2470 = vmatprep.mubr.msk.f32.mxu0 %vm3023_vm1, %v3022_v33  ;;  %2683 = vmatpush3.bf16.msra.mxu0 %v2682_v60 }
  0xe6   :  { %2473 = vmatprep.subr.mxu0 %v3022_v33 }
 0x17e   :  { %v342_v61 = vpop.f32.mrb[0].mxu1 }
 0x17f   :  { %v344_v62 = vpop.f32.mrb[1].mxu1  ;;  %v343_v26 = vadd.f32 %v342_v61, %v197_v22 }
 0x197   :  { %v460_v7 = vpop.f32.mrb[0].mxu0 }
 0x198   :  { %v2708_v9 = vadd.f32 %v460_v7, %v189_v6  ;;  %v462_v10 = vpop.f32.mrb[1].mxu0 }
 0x199   :  { %v2709_v12 = vadd.f32 %v462_v10, %v193_v8 }
 0x19a   :  { %v2284_v11 = vmul.f32 -1.442695, %v2708_v9 }
 0x19b   :  { %v2285_v13 = vmul.f32 -1.442695, %v2709_v12  ;;  %v681_v39 = vpop.f32.mrb[2].mxu0 }
 0x19c   :  { %2734 = vpow2.f32 %v2284_v11  ;;  %v682_v40 = vadd.f32 %v681_v39, %v579_v37  ;;  %v3024_v11 = vmov 1966171168  }
 0x19d   :  { %2736 = vpow2.f32 %v2285_v13  ;;  %v924_v12 = vunpack.c.l.s4 %v3024_v11 }
 0x19e   :  { %v531_v14 = vpop.f32.mrb[2].mxu1 }
 0x19f   :  { %v2423_v15 = vpop.f32.mrb[3].mxu1  ;;  %v555_v24 = vadd.f32 %v2286_v20, %v531_v14  ;;  %v925_v13 = vunpack.c.0.s8 %v924_v12 }
 0x1a1   :  { %v3304_v14 = vsub.s32 %v925_v13, %v3250_v2  ;;  %v1064_v13 = vand.u32 127, %v186_v1 }
 0x1a6   :  { %v2735_v16 = vpop.eup %2734 }
 0x1a7   :  { %v539_v17 = vadd.f32 1.0, %v2735_v16  ;;  %v2737_v19 = vpop.eup %2736 }
 0x1a8   :  { %v546_v23 = vadd.f32 1.0, %v2737_v19 }
 0x1a9   :  { %2738 = vrcp.f32 %v539_v17 }
 0x1aa   :  { %2740 = vrcp.f32 %v546_v23 }
 0x1b3   :  { %v2739_v25 = vpop.eup %2738 }
 0x1b4   :  { %v556_v27 = vmul.f32 %v2739_v25, %v555_v24  ;;  %v2741_v29 = vpop.eup %2740 }
 0x1b5   :  { %v559_v30 = vsub.f32 1.0, %v2741_v29  ;;  %v561_v34 = vmul.f32 %v2741_v29, %v3208_v21  ;;  %v683_v21 = vpop.f32.mrb[3].mxu0 }
 0x1b6   :  { %v557_v28 = vadd.f32 %v556_v27, %v343_v26  ;;  %v684_v41 = vadd.f32 %v683_v21, %v583_v38  ;;  %v687_v42 = vpop.f32.mrb[4].mxu0 }
 0x1b7   :  { %v3290_v43 = vadd.f32 %v687_v42, %v579_v37  ;;  %v689_v44 = vpop.f32.mrb[5].mxu0 }
 0x1b8   :  { %2742 = vtanh.f32 %v557_v28  ;;  %v690_v45 = vadd.f32 %v689_v44, %v583_v38  ;;  %v693_v46 = vpop.f32.mrb[6].mxu0 }
 0x1b9   :  { %v3292_v47 = vadd.f32 %v693_v46, %v579_v37  ;;  %v695_v48 = vpop.f32.mrb[7].mxu0 }
 0x1ba   :  { %v696_v49 = vadd.f32 %v695_v48, %v583_v38  ;;  %v699_v50 = vpop.f32.mrb[8].mxu0 }
 0x1bb   :  { %v700_v51 = vadd.f32 %v699_v50, %v579_v37  ;;  %v701_v52 = vpop.f32.mrb[9].mxu0 }
 0x1bc   :  { %v702_v53 = vadd.f32 %v701_v52, %v583_v38  ;;  %v705_v54 = vpop.f32.mrb[10].mxu0 }
 0x1bd   :  { %2489 = vmatpush3.msra.mxu1 %v700_v51  ;;  %v3295_v55 = vadd.f32 %v705_v54, %v579_v37  ;;  %v707_v56 = vpop.f32.mrb[11].mxu0 }
 0x1be   :  { %2493 = vmatprep.subr.mxu1 %v3022_v33  ;;  %v708_v57 = vadd.f32 %v707_v56, %v583_v38  ;;  %v711_v58 = vpop.f32.mrb[12].mxu0 }
 0x1bf   :  { %v3297_v59 = vadd.f32 %v711_v58, %v579_v37  ;;  %v713_v60 = vpop.f32.mrb[13].mxu0 }
 0x1c0   :  { %v714_v61 = vadd.f32 %v713_v60, %v583_v38  ;;  %v717_v62 = vpop.f32.mrb[14].mxu0 }
 0x1c1   :  { %v3299_v63 = vadd.f32 %v717_v62, %v579_v37  ;;  %v719_v4 = vpop.f32.mrb[15].mxu0 }
 0x1c2   :  { %v2743_v31 = vpop.eup %2742  ;;  %v720_v6 = vadd.f32 %v719_v4, %v583_v38  ;;  %v723_v7 = vpop.f32.mrb[16].mxu0 }
 0x1c3   :  { %v560_v32 = vmul.f32 %v2743_v31, %v559_v30  ;;  %v3301_v8 = vadd.f32 %v723_v7, %v579_v37  ;;  %v725_v9 = vpop.f32.mrb[17].mxu0 }
 0x1c4   :  { %v726_v10 = vadd.f32 %v725_v9, %v583_v38 }
 0x1c5   :  { %v562_v35 = vadd.f32 %v561_v34, %v560_v32 }
 0x1c7   :  { %2471 = vmatmul.mubr.f32.vlgmr.msra.gmra.mrb[18].mxu0 %v562_v35  ;;  %563 = vst [vmem:[#allocation15] sm:$0xff] %v562_v35 }
 0x1c8   :  { %2475 = vmatprep.mubr.msk.f32.mxu0 %vm3023_vm1, %v3022_v33  ;;  %2474 = vmatpush3.msra.mxu0 %v682_v40 }
 0x1c9   :  { %2478 = vmatprep.subr.mxu0 %v3022_v33 }
 0x29a   :  { %v917_v15 = vpop.f32.mrb[18].mxu0 }
 0x29b   :  { %v922_v16 = vcombine.high %v917_v15, %v917_v15  ;;  %v929_v17 = vrot.slane %v917_v15, %v3304_v14  ;;  %v2472_v19 = vpop.f32.mrb[19].mxu0 }
 0x29d   :  { %v936_v20 = vrot.slane %v922_v16, %v3304_v14  ;;  %v937_v22 = vcombine.high %v929_v17, %v929_v17  ;;  %v945_v23 = vrot.slane %v929_v17, %v3304_v14  ;;  %v3325_v16 = vsub.s32 %v1064_v13, %v3250_v2 }
 0x29f   :  { %v938_v24 = vcombine.high %v936_v20, %v936_v20  ;;  %v952_v25 = vrot.slane %v936_v20, %v3304_v14  ;;  %v959_v26 = vrot.slane %v937_v22, %v3304_v14  ;;  %v967_v27 = vcombine.high %v945_v23, %v945_v23 }
 0x2a0   :  { %v974_v28 = vrot.slane %v945_v23, %v3255_v3 }
 0x2a1   :  { %v966_v29 = vrot.slane %v938_v24, %v3304_v14  ;;  %v968_v30 = vcombine.high %v952_v25, %v952_v25  ;;  %v969_v31 = vcombine.high %v959_v26, %v959_v26  ;;  %v978_v32 = vrot.slane %v959_v26, %v3255_v3 }
 0x2a2   :  { %v982_v34 = vrot.slane %v967_v27, %v3255_v3  ;;  %v990_v35 = vrot.slane %v952_v25, %v3255_v3  ;;  %v1011_v37 = vadd.f32 %v974_v28, %v684_v41  ;;  %v2303_v41 = vld [vmem:[%s3546_s8] ss:$0 sm:$0xff] }
 0x2a3   :  { %v970_v38 = vcombine.high %v966_v29, %v966_v29  ;;  %v986_v39 = vrot.slane %v969_v31, %v3255_v3  ;;  %v994_v40 = vrot.slane %v966_v29, %v3255_v3  ;;  %v998_v21 = vrot.slane %v968_v30, %v3255_v3 }
 0x2a4   :  { %v1012_v42 = vadd.f32 %v978_v32, %v690_v45  ;;  %v1013_v44 = vadd.f32 %v982_v34, %v696_v49  ;;  %v1015_v46 = vadd.f32 %v990_v35, %v708_v57  ;;  %2744 = vtanh.f32 %v1011_v37 }
 0x2a5   :  { %v1002_v48 = vrot.slane %v970_v38, %v3255_v3  ;;  %v1014_v50 = vadd.f32 %v986_v39, %v702_v53  ;;  %v1016_v51 = vadd.f32 %v994_v40, %v714_v61  ;;  %v1017_v52 = vadd.f32 %v998_v21, %v720_v6 }
 0x2a6   :  { %2746 = vtanh.f32 %v1012_v42 }
 0x2a7   :  { %2748 = vtanh.f32 %v1013_v44  ;;  %v1018_v54 = vadd.f32 %v1002_v48, %v726_v10  ;;  %v3025_v44 = vmov 0  }
 0x2a8   :  { %2750 = vtanh.f32 %v1014_v50  ;;  %2733 = vset.pattern.permute.xlu0 %v3025_v44  ;;  %2732 = vset.pattern.permute.xlu1 %v3025_v44 }
 0x2a9   :  { %2752 = vtanh.f32 %v1015_v46  ;;  %v1130_v46 = vsub.s32 3, %v3250_v2 }
 0x2aa   :  { %2754 = vtanh.f32 %v1016_v51 }
 0x2ab   :  { %2756 = vtanh.f32 %v1017_v52 }
 0x2ac   :  { %2758 = vtanh.f32 %v1018_v54  ;;  %v1134_v54 = vsub.s32 4, %v3250_v2 }
 0x2ae   :  { %v2745_v56 = vpop.eup %2744 }
 0x2af   :  { %v1031_v45 = vmul.f32 %v2745_v56, %v2303_v41 }
 0x2b0   :  { %v2747_v49 = vpop.eup %2746 }
 0x2b1   :  { %v2749_v57 = vpop.eup %2748  ;;  %1039 = vadd.xlane.f32.xlu0 %v1031_v45  ;;  %v1032_v60 = vmul.f32 %v2747_v49, %v2303_v41 }
 0x2b2   :  { %v1033_v53 = vmul.f32 %v2749_v57, %v2303_v41  ;;  %v2751_v58 = vpop.eup %2750 }
 0x2b3   :  { %v2753_v61 = vpop.eup %2752  ;;  %v1034_v62 = vmul.f32 %v2751_v58, %v2303_v41  ;;  %v1138_v58 = vsub.s32 5, %v3250_v2 }
 0x2b4   :  { %1043 = vadd.xlane.f32.xlu1 %v1033_v53  ;;  %v2755_v4 = vpop.eup %2754  ;;  %v1035_v6 = vmul.f32 %v2753_v61, %v2303_v41 }
 0x2b5   :  { %1041 = vadd.xlane.f32.xlu0 %v1032_v60  ;;  %v2757_v7 = vpop.eup %2756  ;;  %v1036_v9 = vmul.f32 %v2755_v4, %v2303_v41  ;;  %v1142_v4 = vsub.s32 6, %v3250_v2 }
 0x2b6   :  { %v2759_v10 = vpop.eup %2758  ;;  %v1037_v11 = vmul.f32 %v2757_v7, %v2303_v41 }
 0x2b7   :  { %v1038_v12 = vmul.f32 %v2759_v10, %v2303_v41  ;;  %v1146_v10 = vsub.s32 7, %v3250_v2 }
 0x2b8   :  { %1045 = vadd.xlane.f32.xlu1 %v1034_v62 }
 0x2b9   :  { %1047 = vadd.xlane.f32.xlu0 %v1035_v6 }
 0x2bc   :  { %1049 = vadd.xlane.f32.xlu1 %v1036_v9 }
 0x2bd   :  { %1051 = vadd.xlane.f32.xlu0 %v1037_v11 }
 0x2c0   :  { %1053 = vadd.xlane.f32.xlu1 %v1038_v12 }
 0x33e   :  { %v1040_v15 = vpop.xlane.xlu0 %1039 }
 0x33f   :  { %v1068_v20 = vrot.slane %v1040_v15, %v3325_v16 }
 0x341   :  { %v1044_v17 = vpop.xlane.xlu1 %1043 }
 0x342   :  { %v1042_v19 = vpop.xlane.xlu0 %1041  ;;  %v1076_v23 = vrot.slane %v1044_v17, %v3325_v16 }
 0x343   :  { %v1072_v22 = vrot.slane %v1042_v19, %v3325_v16 }
 0x345   :  { %v1098_v24 = vsel %vm1097_vm2, %v1072_v22, %v1068_v20  ;;  %v1046_v25 = vpop.xlane.xlu1 %1045 }
 0x346   :  { %v1100_v1 = vsel %vm1099_vm3, %v1076_v23, %v1098_v24  ;;  %v1080_v26 = vrot.slane %v1046_v25, %v3325_v16  ;;  %v1048_v27 = vpop.xlane.xlu0 %1047 }
 0x347   :  { %v1084_v28 = vrot.slane %v1048_v27, %v3325_v16 }
 0x348   :  { %v1102_v29 = vsel %vm1101_vm4, %v1080_v26, %v1100_v1 }
 0x349   :  { %v1104_v30 = vsel %vm1103_vm5, %v1084_v28, %v1102_v29  ;;  %v1050_v31 = vpop.xlane.xlu1 %1049 }
 0x34a   :  { %v1088_v32 = vrot.slane %v1050_v31, %v3325_v16  ;;  %v1052_v34 = vpop.xlane.xlu0 %1051 }
 0x34b   :  { %v1092_v35 = vrot.slane %v1052_v34, %v3325_v16 }
 0x34c   :  { %v1106_v37 = vsel %vm1105_vm6, %v1088_v32, %v1104_v30 }
 0x34d   :  { %v1054_v38 = vpop.xlane.xlu1 %1053  ;;  %v1108_v39 = vsel %vm1107_vm7, %v1092_v35, %v1106_v37 }
 0x34e   :  { %v1096_v40 = vrot.slane %v1054_v38, %v3325_v16 }
 0x350   :  { %v1110_v21 = vsel %vm1109_vm8, %v1096_v40, %v1108_v39 }
 0x351   :  { %v1112_v42 = vsel %vm201_vm0, %v1110_v21, -inf }
 0x352   :  { %1113 = vmax.xlane.f32.xlu0 %v1112_v42 }
 0x3df   :  { %v1114_v48 = vpop.xlane.xlu0 %1113 }
 0x3e0   :  { %v1119_v50 = vrot.slane %v1114_v48, %v3255_v3  ;;  %v1123_v51 = vrot.slane %v1114_v48, %v3262_v5  ;;  %v1127_v52 = vrot.slane %v1114_v48, %v3271_v18  ;;  %v1131_v41 = vrot.slane %v1114_v48, %v1130_v46 }
 0x3e1   :  { %v1135_v60 = vrot.slane %v1114_v48, %v1134_v54  ;;  %v1139_v6 = vrot.slane %v1114_v48, %v1138_v58  ;;  %v1143_v11 = vrot.slane %v1114_v48, %v1142_v4 }
 0x3e2   :  { %v1156_v56 = vsub.f32 %v1040_v15, %v1119_v50  ;;  %v1157_v45 = vsub.f32 %v1042_v19, %v1123_v51  ;;  %v1158_v49 = vsub.f32 %v1044_v17, %v1127_v52  ;;  %v1159_v61 = vsub.f32 %v1046_v25, %v1131_v41 }
 0x3e3   :  { %v1160_v7 = vsub.f32 %v1048_v27, %v1135_v60  ;;  %v1161_v12 = vsub.f32 %v1050_v31, %v1139_v6  ;;  %v1147_v19 = vrot.slane %v1114_v48, %v1146_v10  ;;  %v1162_v20 = vsub.f32 %v1052_v34, %v1143_v11 }
 0x3e4   :  { %v1164_v57 = vmul.f32 1.442695, %v1156_v56  ;;  %v1166_v53 = vmul.f32 1.442695, %v1157_v45  ;;  %v1168_v62 = vmul.f32 1.442695, %v1158_v49 }
 0x3e5   :  { %v1170_v9 = vmul.f32 1.442695, %v1159_v61  ;;  %v1172_v13 = vmul.f32 1.442695, %v1160_v7  ;;  %v1174_v22 = vmul.f32 1.442695, %v1161_v12  ;;  %v1163_v24 = vsub.f32 %v1054_v38, %v1147_v19 }
 0x3e6   :  { %2760 = vpow2.f32 %v1164_v57  ;;  %v1176_v25 = vmul.f32 1.442695, %v1162_v20 }
 0x3e7   :  { %2762 = vpow2.f32 %v1166_v53  ;;  %v1178_v26 = vmul.f32 1.442695, %v1163_v24 }
 0x3e8   :  { %2764 = vpow2.f32 %v1168_v62 }
 0x3e9   :  { %2766 = vpow2.f32 %v1170_v9 }
 0x3ea   :  { %2768 = vpow2.f32 %v1172_v13 }
 0x3eb   :  { %2770 = vpow2.f32 %v1174_v22 }
 0x3ec   :  { %2772 = vpow2.f32 %v1176_v25 }
 0x3ed   :  { %2774 = vpow2.f32 %v1178_v26 }
 0x3f0   :  { %v2761_v15 = vpop.eup %2760 }
 0x3f1   :  { %v2763_v17 = vpop.eup %2762  ;;  %1189 = vperm.xlu1 %2732, %v2761_v15  }
 0x3f2   :  { %1192 = vperm.xlu0 %2733, %v2763_v17   ;;  %v2765_v23 = vpop.eup %2764 }
 0x3f3   :  { %v2767_v1 = vpop.eup %2766 }
 0x3f4   :  { %v2769_v27 = vpop.eup %2768 }
 0x3f5   :  { %1195 = vperm.xlu1 %2732, %v2765_v23   ;;  %v2771_v28 = vpop.eup %2770 }
 0x3f6   :  { %v2773_v29 = vpop.eup %2772 }
 0x3f7   :  { %v2775_v30 = vpop.eup %2774 }
 0x3f9   :  { %1198 = vperm.xlu1 %2732, %v2767_v1  }
 0x3fd   :  { %1201 = vperm.xlu1 %2732, %v2769_v27  }
 0x401   :  { %1204 = vperm.xlu1 %2732, %v2771_v28  }
 0x405   :  { %1207 = vperm.xlu1 %2732, %v2773_v29  }
 0x409   :  { %1210 = vperm.xlu1 %2732, %v2775_v30  }
 0x470   :  { %v1190_v31 = vpop.permute.xlu1 %1189 }
 0x471   :  { %v1193_v37 = vpop.permute.xlu0 %1192  ;;  %v1215_v40 = vrot.slane %v1190_v31, %v3325_v16 }
 0x472   :  { %v1219_v39 = vrot.slane %v1193_v37, %v3325_v16 }
 0x474   :  { %v1196_v32 = vpop.permute.xlu1 %1195  ;;  %v1244_v50 = vsel %vm1097_vm2, %v1219_v39, %v1215_v40 }
 0x475   :  { %v1223_v21 = vrot.slane %v1196_v32, %v3325_v16 }
 0x477   :  { %v1245_v52 = vsel %vm1099_vm3, %v1223_v21, %v1244_v50 }
 0x478   :  { %v1199_v34 = vpop.permute.xlu1 %1198 }
 0x479   :  { %v1227_v42 = vrot.slane %v1199_v34, %v3325_v16 }
 0x47b   :  { %v1246_v56 = vsel %vm1101_vm4, %v1227_v42, %v1245_v52  ;;  %v1948_v52 = vld [vmem:[#allocation13 + $0x38] sm:$0xff] }
 0x47c   :  { %v1202_v35 = vpop.permute.xlu1 %1201 }
 0x47d   :  { %v1231_v44 = vrot.slane %v1202_v35, %v3325_v16 }
 0x47f   :  { %v1247_v45 = vsel %vm1103_vm5, %v1231_v44, %v1246_v56 }
 0x480   :  { %v1205_v38 = vpop.permute.xlu1 %1204 }
 0x481   :  { %v1235_v51 = vrot.slane %v1205_v38, %v3325_v16  ;;  %v1946_v38 = vld [vmem:[#allocation13 + $0x18] sm:$0xff] }
 0x483   :  { %v1248_v57 = vsel %vm1105_vm6, %v1235_v51, %v1247_v45  ;;  %v1947_v51 = vld [vmem:[#allocation13 + $0x28] sm:$0xff] }
 0x484   :  { %v1208_v48 = vpop.permute.xlu1 %1207  ;;  %v2688_v56 = vpack.c.bf16 %v1948_v52, %v1947_v51 }
 0x485   :  { %v1239_v41 = vrot.slane %v1208_v48, %v3325_v16 }
 0x487   :  { %v1249_v60 = vsel %vm1107_vm7, %v1239_v41, %v1248_v57 }
 0x488   :  { %v1211_v49 = vpop.permute.xlu1 %1210 }
 0x489   :  { %v1243_v53 = vrot.slane %v1211_v49, %v3325_v16 }
 0x48b   :  { %v1250_v61 = vsel %vm1109_vm8, %v1243_v53, %v1249_v60  ;;  %v1949_v53 = vld [vmem:[#allocation13 + $0x48] sm:$0xff]  ;;  %v1950_v60 = vld [vmem:[#allocation13 + $0x58] sm:$0xff] }
 0x48c   :  { %v1252_v62 = vsel %vm201_vm0, %v1250_v61, 0.0 }
 0x48d   :  { %1253 = vadd.xlane.f32.xlu1 %v1252_v62  ;;  %v2691_v62 = vpack.c.bf16 %v1950_v60, %v1949_v53 }
 0x51a   :  { %v1254_v6 = vpop.xlane.xlu1 %1253 }
 0x51b   :  { %2776 = vrcp.f32 %v1254_v6  ;;  %v1951_v6 = vld [vmem:[#allocation13 + $0x68] sm:$0xff] }
 0x525   :  { %v2777_v7 = vpop.eup %2776 }
 0x526   :  { %v1260_v9 = vrot.slane %v2777_v7, %v3255_v3  ;;  %v1264_v12 = vrot.slane %v2777_v7, %v3262_v5  ;;  %v1272_v19 = vrot.slane %v2777_v7, %v1130_v46  ;;  %v1268_v22 = vrot.slane %v2777_v7, %v3271_v18 }
 0x527   :  { %v1276_v25 = vrot.slane %v2777_v7, %v1134_v54  ;;  %v3392_v54 = vrot.slane %v3283_v36, %v3271_v18 }
 0x528   :  { %v1297_v11 = vmul.f32 %v2761_v15, %v1260_v9  ;;  %v1298_v13 = vmul.f32 %v2763_v17, %v1264_v12  ;;  %v1300_v20 = vmul.f32 %v2767_v1, %v1272_v19  ;;  %v1299_v24 = vmul.f32 %v2765_v23, %v1268_v22  ;;  %v1954_v12 = vld [vmem:[#allocation13 + $0x98] sm:$0xff]  ;;  %v1955_v19 = vld [vmem:[#allocation13 + $0xa8] sm:$0xff] }
 0x529   :  { %v1301_v26 = vmul.f32 %v2769_v27, %v1276_v25  ;;  %v1280_v15 = vrot.slane %v2777_v7, %v1138_v58  ;;  %v1284_v17 = vrot.slane %v2777_v7, %v1142_v4  ;;  %v1288_v1 = vrot.slane %v2777_v7, %v1146_v10  ;;  %v2428_v27 = vpop.f32.mrb[4].mxu1  ;;  %v1952_v7 = vld [vmem:[#allocation13 + $0x78] sm:$0xff] }
 0x52a   :  { %1307 = vperm.xlu0 %2733, %v1297_v11   ;;  %v3395_v58 = vadd.f32 %v2428_v27, %v3392_v54  ;;  %v794_v35 = vpop.f32.mrb[5].mxu1  ;;  %v2694_v9 = vpack.c.bf16 %v1952_v7, %v1951_v6  ;;  %v1953_v11 = vld [vmem:[#allocation13 + $0x88] sm:$0xff]  ;;  %v1958_v25 = vld [vmem:[#allocation13 + $0xd8] sm:$0xff] }
 0x52b   :  { %v1302_v5 = vmul.f32 %v2771_v28, %v1280_v15  ;;  %v1303_v46 = vmul.f32 %v2773_v29, %v1284_v17  ;;  %v1304_v23 = vmul.f32 %v2775_v30, %v1288_v1  ;;  %v3439_v37 = vadd.f32 %v794_v35, %v3392_v54  ;;  %v2431_v39 = vpop.f32.mrb[6].mxu1  ;;  %v1959_v15 = vld [vmem:[#allocation13 + $0xe8] sm:$0xff] }
 0x52c   :  { %v3442_v21 = vadd.f32 %v2431_v39, %v3392_v54  ;;  %v804_v42 = vpop.f32.mrb[7].mxu1 }
 0x52d   :  { %v3445_v44 = vadd.f32 %v804_v42, %v3392_v54 }
 0x52e   :  { %1387 = vperm.xlu0 %2733, %v1298_v13   ;;  %v2697_v13 = vpack.c.bf16 %v1954_v12, %v1953_v11 }
 0x532   :  { %1547 = vperm.xlu0 %2733, %v1300_v20   ;;  %v1956_v20 = vld [vmem:[#allocation13 + $0xb8] sm:$0xff] }
 0x533   :  { %v2700_v22 = vpack.c.bf16 %v1956_v20, %v1955_v19 }
 0x536   :  { %1467 = vperm.xlu0 %2733, %v1299_v24   ;;  %v1957_v24 = vld [vmem:[#allocation13 + $0xc8] sm:$0xff] }
 0x53a   :  { %1627 = vperm.xlu0 %2733, %v1301_v26   ;;  %v2703_v26 = vpack.c.bf16 %v1958_v25, %v1957_v24 }
 0x53e   :  { %1707 = vperm.xlu0 %2733, %v1302_v5   ;;  %v1960_v5 = vld [vmem:[#allocation13 + $0xf8] sm:$0xff] }
 0x53f   :  { %v2706_v17 = vpack.c.bf16 %v1960_v5, %v1959_v15 }
 0x542   :  { %1787 = vperm.xlu0 %2733, %v1303_v46  }
 0x546   :  { %1867 = vperm.xlu0 %2733, %v1304_v23  }
 0x5a9   :  { %v1308_v28 = vpop.permute.xlu0 %1307 }
 0x5aa   :  { %v1312_v31 = vrot.slane %v1308_v28, %v3325_v16 }
 0x5ac   :  { %2476 = vmatmul.mubr.msk.f32.vlgmr.msra.gmra.mrb[20].mxu0 %vm201_vm0, %v1312_v31 }
 0x5ad   :  { %2479 = vmatpush3.msra.mxu0 %v3290_v43  ;;  %v1388_v2 = vpop.permute.xlu0 %1387  ;;  %2480 = vmatprep.mubr.msk.f32.mxu0 %vm3023_vm1, %v3022_v33 }
 0x5ae   :  { %v1392_v4 = vrot.slane %v1388_v2, %v3325_v16  ;;  %2483 = vmatprep.subr.mxu0 %v3022_v33 }
 0x5b0   :  { %2481 = vmatmul.mubr.msk.f32.vlgmr.msra.gmra.mrb[22].mxu0 %vm201_vm0, %v1392_v4 }
 0x5b1   :  { %2484 = vmatpush3.msra.mxu0 %v3292_v47  ;;  %v1548_v18 = vpop.permute.xlu0 %1547  ;;  %2485 = vmatprep.mubr.msk.f32.mxu0 %vm3023_vm1, %v3022_v33 }
 0x5b2   :  { %v1552_v36 = vrot.slane %v1548_v18, %v3325_v16  ;;  %2498 = vmatprep.subr.mxu0 %v3022_v33 }
 0x5b4   :  { %2491 = vmatmul.mubr.msk.f32.vlgmr.msra.gmra.mrb[12].mxu1 %vm201_vm0, %v1552_v36 }
 0x5b5   :  { %2494 = vmatpush3.msra.mxu1 %v3295_v55  ;;  %v1468_v43 = vpop.permute.xlu0 %1467  ;;  %2495 = vmatprep.mubr.msk.f32.mxu1 %vm3023_vm1, %v3022_v33 }
 0x5b6   :  { %v1472_v10 = vrot.slane %v1468_v43, %v3325_v16  ;;  %2503 = vmatprep.subr.mxu1 %v3022_v33 }
 0x5b8   :  { %2486 = vmatmul.mubr.msk.f32.vlgmr.msra.gmra.mrb[24].mxu0 %vm201_vm0, %v1472_v10 }
 0x5b9   :  { %2499 = vmatpush3.msra.mxu0 %v3297_v59  ;;  %v1628_v47 = vpop.permute.xlu0 %1627  ;;  %2500 = vmatprep.mubr.msk.f32.mxu0 %vm3023_vm1, %v3022_v33 }
 0x5ba   :  { %v1632_v29 = vrot.slane %v1628_v47, %v3325_v16  ;;  %2508 = vmatprep.subr.mxu0 %v3022_v33 }
 0x5bc   :  { %2496 = vmatmul.mubr.msk.f32.vlgmr.msra.gmra.mrb[14].mxu1 %vm201_vm0, %v1632_v29 }
 0x5bd   :  { %2504 = vmatpush3.msra.mxu1 %v3299_v63  ;;  %v1708_v55 = vpop.permute.xlu0 %1707  ;;  %2505 = vmatprep.mubr.msk.f32.mxu1 %vm3023_vm1, %v3022_v33 }
 0x5be   :  { %v1712_v30 = vrot.slane %v1708_v55, %v3325_v16  ;;  %2684 = vmatprep.subr.bf16.mxu1 %v3021_v0 }
 0x5c0   :  { %2501 = vmatmul.mubr.msk.f32.vlgmr.msra.gmra.mrb[26].mxu0 %vm201_vm0, %v1712_v30 }
 0x5c1   :  { %2509 = vmatpush3.msra.mxu0 %v3301_v8  ;;  %v1788_v59 = vpop.permute.xlu0 %1787  ;;  %2510 = vmatprep.mubr.msk.f32.mxu0 %vm3023_vm1, %v3022_v33  ;;  %v1945_v8 = vld [vmem:[#allocation13 + $0x8] sm:$0xff] }
 0x5c2   :  { %v1792_v32 = vrot.slane %v1788_v59, %v3325_v16  ;;  %v2685_v40 = vpack.c.bf16 %v1946_v38, %v1945_v8 }
 0x5c4   :  { %2506 = vmatmul.mubr.msk.f32.vlgmr.msra.gmra.mrb[16].mxu1 %vm201_vm0, %v1792_v32 }
 0x5c5   :  { %v1868_v63 = vpop.permute.xlu0 %1867  ;;  %2545 = vmatprep.mubr.msk.f32.mxu1 %vm3023_vm1, %v3022_v33  ;;  %v2434_v33 = vpop.f32.mrb[8].mxu1  ;;  %2686 = vmatpush3.bf16.msra.mxu1 %v2685_v40 }
 0x5c6   :  { %v1872_v34 = vrot.slane %v1868_v63, %v3325_v16  ;;  %v3448_v48 = vadd.f32 %v2434_v33, %v3392_v54  ;;  %2687 = vmatprep.subr.bf16.mxu1 %v3021_v0  ;;  %v814_v50 = vpop.f32.mrb[9].mxu1 }
 0x5c7   :  { %v3452_v41 = vadd.f32 %v814_v50, %v3392_v54  ;;  %v2437_v45 = vpop.f32.mrb[10].mxu1 }
 0x5c8   :  { %2511 = vmatmul.mubr.msk.f32.vlgmr.msra.gmra.mrb[28].mxu0 %vm201_vm0, %v1872_v34  ;;  %v3455_v49 = vadd.f32 %v2437_v45, %v3392_v54  ;;  %v824_v57 = vpop.f32.mrb[11].mxu1 }
 0x5c9   :  { %2689 = vmatpush3.bf16.msra.mxu1 %v2688_v56  ;;  %v3458_v61 = vadd.f32 %v824_v57, %v3392_v54 }
 0x5ca   :  { %2690 = vmatprep.subr.bf16.mxu1 %v3021_v0 }
 0x5cd   :  { %2692 = vmatpush3.bf16.msra.mxu1 %v2691_v62 }
 0x5ce   :  { %2693 = vmatprep.subr.bf16.mxu1 %v3021_v0 }
 0x5d1   :  { %2695 = vmatpush3.bf16.msra.mxu1 %v2694_v9 }
 0x5d2   :  { %2696 = vmatprep.subr.bf16.mxu1 %v3021_v0 }
 0x5d5   :  { %2698 = vmatpush3.bf16.msra.mxu1 %v2697_v13 }
 0x5d6   :  { %2699 = vmatprep.subr.bf16.mxu1 %v3021_v0 }
 0x5d9   :  { %2701 = vmatpush3.bf16.msra.mxu1 %v2700_v22 }
 0x5da   :  { %2702 = vmatprep.subr.bf16.mxu1 %v3021_v0 }
 0x5dd   :  { %2704 = vmatpush3.bf16.msra.mxu1 %v2703_v26 }
 0x5de   :  { %2705 = vmatprep.subr.bf16.mxu1 %v3021_v0 }
 0x5e1   :  { %2707 = vmatpush3.bf16.msra.mxu1 %v2706_v17 }
 0x67f   :  { %v1381_v46 = vpop.f32.mrb[20].mxu0 }
 0x680   :  { %v2477_v1 = vpop.f32.mrb[21].mxu0 }
 0x683   :  { %v1461_v23 = vpop.f32.mrb[22].mxu0 }
 0x684   :  { %v1969_v54 = vrot.slane %v1461_v23, 7  ;;  %v2482_v27 = vpop.f32.mrb[23].mxu0 }
 0x686   :  { %v1970_v28 = vsel %vm1097_vm2, %v1969_v54, %v1381_v46 }
 0x687   :  { %v1621_v31 = vpop.f32.mrb[12].mxu1 }
 0x688   :  { %v2492_v2 = vpop.f32.mrb[13].mxu1  ;;  %v1973_v43 = vrot.slane %v1621_v31, 5 }
 0x68b   :  { %v1541_v4 = vpop.f32.mrb[24].mxu0 }
 0x68c   :  { %v1971_v18 = vrot.slane %v1541_v4, 6  ;;  %v2487_v36 = vpop.f32.mrb[25].mxu0 }
 0x68e   :  { %v1972_v10 = vsel %vm1099_vm3, %v1971_v18, %v1970_v28 }
 0x68f   :  { %v1701_v47 = vpop.f32.mrb[14].mxu1  ;;  %v1974_v29 = vsel %vm1101_vm4, %v1973_v43, %v1972_v10 }
 0x690   :  { %v1975_v0 = vrot.slane %v1701_v47, 4  ;;  %v2497_v55 = vpop.f32.mrb[15].mxu1 }
 0x692   :  { %v1976_v30 = vsel %vm1103_vm5, %v1975_v0, %v1974_v29 }
 0x693   :  { %v1781_v59 = vpop.f32.mrb[26].mxu0 }
 0x694   :  { %v1977_v32 = vrot.slane %v1781_v59, 3  ;;  %v2502_v63 = vpop.f32.mrb[27].mxu0 }
 0x696   :  { %v1978_v34 = vsel %vm1105_vm6, %v1977_v32, %v1976_v30 }
 0x697   :  { %v1861_v35 = vpop.f32.mrb[16].mxu1 }
 0x698   :  { %v1979_v8 = vrot.slane %v1861_v35, 2  ;;  %v2507_v38 = vpop.f32.mrb[17].mxu1 }
 0x69a   :  { %v1980_v39 = vsel %vm1107_vm7, %v1979_v8, %v1978_v34 }
 0x69b   :  { %v1941_v40 = vpop.f32.mrb[28].mxu0 }
 0x69c   :  { %v1981_v42 = vrot.slane %v1941_v40, 1  ;;  %v2512_v33 = vpop.f32.mrb[29].mxu0 }
 0x69e   :  { %v1982_v50 = vsel %vm1109_vm8, %v1981_v42, %v1980_v39 }
 0x69f   :  { %2546 = vmatmul.mubr.f32.vlgmr.msra.gmra.mrb[18].mxu1 %v1982_v50 }
 0x772   :  { %v2050_v51 = vpop.f32.mrb[18].mxu1 }
 0x773   :  { %v2055_v52 = vcombine.high %v2050_v51, %v2050_v51  ;;  %v2062_v56 = vrot.slane %v2050_v51, %v3304_v14  ;;  %v2547_v45 = vpop.f32.mrb[19].mxu1 }
 0x775   :  { %v2069_v57 = vrot.slane %v2055_v52, %v3304_v14  ;;  %v2070_v53 = vcombine.high %v2062_v56, %v2062_v56  ;;  %v2078_v60 = vrot.slane %v2062_v56, %v3304_v14  ;;  %v2188_v56 = vld [vmem:[#allocation7] sm:$0xff] }
 0x776   :  { %vm2189_vm9 = vcmp.gt.f32.partialorder %v2188_v56, 0.0 }
 0x777   :  { %v2071_v62 = vcombine.high %v2069_v57, %v2069_v57  ;;  %v2085_v6 = vrot.slane %v2069_v57, %v3304_v14  ;;  %v2092_v7 = vrot.slane %v2070_v53, %v3304_v14  ;;  %v2100_v9 = vcombine.high %v2078_v60, %v2078_v60 }
 0x778   :  { %v2107_v11 = vrot.slane %v2078_v60, %v3255_v3 }
 0x779   :  { %v2099_v12 = vrot.slane %v2071_v62, %v3304_v14  ;;  %v2101_v13 = vcombine.high %v2085_v6, %v2085_v6  ;;  %v2102_v19 = vcombine.high %v2092_v7, %v2092_v7  ;;  %v2111_v20 = vrot.slane %v2092_v7, %v3255_v3 }
 0x77a   :  { %v2115_v22 = vrot.slane %v2100_v9, %v3255_v3  ;;  %v2123_v24 = vrot.slane %v2085_v6, %v3255_v3  ;;  %v2144_v25 = vadd.f32 %v2107_v11, %v3439_v37 }
 0x77b   :  { %v2103_v26 = vcombine.high %v2099_v12, %v2099_v12  ;;  %v2119_v15 = vrot.slane %v2102_v19, %v3255_v3  ;;  %v2127_v5 = vrot.slane %v2099_v12, %v3255_v3  ;;  %v2131_v17 = vrot.slane %v2101_v13, %v3255_v3 }
 0x77c   :  { %v2145_v46 = vadd.f32 %v2111_v20, %v3395_v58  ;;  %v2146_v14 = vadd.f32 %v2115_v22, %v3445_v44  ;;  %v2148_v1 = vadd.f32 %v2123_v24, %v3452_v41  ;;  %2778 = vtanh.f32 %v2144_v25  ;;  %v2312_v58 = vld [vmem:[%s3546_s8 + $0x1] ss:$0 sm:$0xff]  ;;  %s3026_s8 = smov [#allocation15]  }
 0x77d   :  { %v2135_v23 = vrot.slane %v2103_v26, %v3255_v3  ;;  %v2147_v54 = vadd.f32 %v2119_v15, %v3442_v21  ;;  %v2149_v37 = vadd.f32 %v2127_v5, %v3448_v48  ;;  %v2150_v27 = vadd.f32 %v2131_v17, %v3458_v61  ;;  %s2266_s2 = sshll.u32 %s3026_s8, 4  ;;  %s2267_s2 = int_to_ptr.vmem [resolvable:$true] %s2266_s2 }
 0x77e   :  { %2780 = vtanh.f32 %v2145_v46  ;;  %s2952_s12 = scalar_lea.vmem %s2267_s2, 128  ;;  %p2957_p1 = scmp.lt.s32.totalorder %s2267_s2, %s2267_s2 }
 0x77f   :  { %2782 = vtanh.f32 %v2146_v14  ;;  %v2151_v28 = vadd.f32 %v2135_v23, %v3455_v49  ;;  %p2953_p0 = scmp.ne.s32.totalorder %s2267_s2, %s2952_s12  ;;  %p2958_p2 = scmp.lt.s32.totalorder %s2952_s12, %s2952_s12 }
 0x780   :  { %2784 = vtanh.f32 %v2148_v1 }
 0x781   :  { %2786 = vtanh.f32 %v2147_v54  ;;  %p2959_p3 = por %p2958_p2, %p2957_p1 }
 0x782   :  { %2788 = vtanh.f32 %v2149_v37 }
 0x783   :  { %2790 = vtanh.f32 %v2150_v27  ;;  %p2960_p4 = pnand %p2959_p3, %p2953_p0 }
 0x784   :  { %2792 = vtanh.f32 %v2151_v28 }
 0x786   :  { %v2779_v44 = vpop.eup %2778 }
 0x787   :  { %v2164_v41 = vmul.f32 %v2779_v44, %v2312_v58 }
 0x788   :  { %v2781_v31 = vpop.eup %2780 }
 0x789   :  { %v2783_v3 = vpop.eup %2782  ;;  %2172 = vadd.xlane.f32.xlu1 %v2164_v41  ;;  %v2165_v21 = vmul.f32 %v2781_v31, %v2312_v58 }
 0x78a   :  { %v2166_v48 = vmul.f32 %v2783_v3, %v2312_v58  ;;  %v2785_v61 = vpop.eup %2784 }
 0x78b   :  { %2174 = vadd.xlane.f32.xlu0 %v2165_v21  ;;  %v2168_v2 = vmul.f32 %v2785_v61, %v2312_v58  ;;  %v2787_v49 = vpop.eup %2786 }
 0x78c   :  { %v2167_v4 = vmul.f32 %v2787_v49, %v2312_v58  ;;  %v2789_v18 = vpop.eup %2788 }
 0x78d   :  { %2176 = vadd.xlane.f32.xlu1 %v2166_v48  ;;  %v2169_v36 = vmul.f32 %v2789_v18, %v2312_v58  ;;  %v2791_v43 = vpop.eup %2790 }
 0x78e   :  { %v2170_v10 = vmul.f32 %v2791_v43, %v2312_v58  ;;  %v2793_v47 = vpop.eup %2792 }
 0x78f   :  { %v2171_v29 = vmul.f32 %v2793_v47, %v2312_v58 }
 0x791   :  { %2180 = vadd.xlane.f32.xlu1 %v2168_v2 }
 0x795   :  { %2178 = vadd.xlane.f32.xlu1 %v2167_v4 }
 0x799   :  { %2182 = vadd.xlane.f32.xlu1 %v2169_v36 }
 0x79d   :  { %2184 = vadd.xlane.f32.xlu1 %v2170_v10 }
 0x7a1   :  { %2186 = vadd.xlane.f32.xlu1 %v2171_v29 }
 0x816   :  { %v2173_v0 = vpop.xlane.xlu1 %2172 }
 0x817   :  { %v2201_v34 = vrot.slane %v2173_v0, %v3325_v16 }
 0x818   :  { %v2175_v59 = vpop.xlane.xlu0 %2174 }
 0x819   :  { %v2205_v63 = vrot.slane %v2175_v59, %v3325_v16 }
 0x81a   :  { %v2177_v55 = vpop.xlane.xlu1 %2176 }
 0x81b   :  { %v2209_v35 = vrot.slane %v2177_v55, %v3325_v16  ;;  %v2230_v38 = vsel %vm1097_vm2, %v2205_v63, %v2201_v34 }
 0x81d   :  { %v2231_v40 = vsel %vm1099_vm3, %v2209_v35, %v2230_v38 }
 0x81e   :  { %v2181_v30 = vpop.xlane.xlu1 %2180 }
 0x81f   :  { %v2217_v51 = vrot.slane %v2181_v30, %v3325_v16 }
 0x822   :  { %v2179_v32 = vpop.xlane.xlu1 %2178 }
 0x823   :  { %v2213_v39 = vrot.slane %v2179_v32, %v3325_v16 }
 0x825   :  { %v2232_v33 = vsel %vm1101_vm4, %v2213_v39, %v2231_v40 }
 0x826   :  { %v2183_v8 = vpop.xlane.xlu1 %2182  ;;  %v2233_v45 = vsel %vm1103_vm5, %v2217_v51, %v2232_v33 }
 0x827   :  { %v2221_v50 = vrot.slane %v2183_v8, %v3325_v16 }
 0x829   :  { %v2234_v53 = vsel %vm1105_vm6, %v2221_v50, %v2233_v45 }
 0x82a   :  { %v2185_v42 = vpop.xlane.xlu1 %2184 }
 0x82b   :  { %v2225_v52 = vrot.slane %v2185_v42, %v3325_v16 }
 0x82d   :  { %v2235_v62 = vsel %vm1107_vm7, %v2225_v52, %v2234_v53 }
 0x82e   :  { %v2187_v57 = vpop.xlane.xlu1 %2186 }
 0x82f   :  { %v2229_v60 = vrot.slane %v2187_v57, %v3325_v16 }
 0x831   :  { %v2236_v6 = vsel %vm1109_vm8, %v2229_v60, %v2235_v62 }
 0x832   :  { %v2238_v7 = vsel %vm2189_vm9, %v2236_v6, -1e+30 }
 0x833   :  { %v2239_v9 = vsel %vm201_vm0, %v2238_v7, -1e+30 }
 0x834   :  { %2240 = vmax.xlane.f32.xlu1 %v2239_v9 }
 0x8c1   :  { %v2241_v11 = vpop.xlane.xlu1 %2240 }
 0x8c2   :  { %v2242_v12 = vsub.f32 %v2239_v9, %v2241_v11 }
 0x8c4   :  { %v2243_v13 = vmul.f32 1.442695, %v2242_v12 }
 0x8c6   :  { %2794 = vpow2.f32 %v2243_v13 }
 0x8d0   :  { %v2795_v19 = vpop.eup %2794 }
 0x8d1   :  { %2245 = vadd.xlane.f32.xlu1 %v2795_v19 }
 0x8d2   :  { %2963 = shalt.err (!%p2960_p4)
}
 0x8d3   :  { %s2964_s17 = scalar_lea.hbm %s3549_s11, 128 }
 0x8d4   :  { %p2965_p5 = scmp.ne.s32.totalorder %s3549_s11, %s2964_s17  ;;  %p2968_p6 = scmp.lt.u32.totalorder %s2964_s17, %s3549_s11 }
 0x8d6   :  { %p2970_p7 = pnand %p2968_p6, %p2965_p5 }
 0x8d8   :  { %2973 = shalt.err (!%p2970_p7)
}
 0x8d9   :  { %2269 = dma.vmem_to_hbm [thread:$0]  %s2267_s2, 128, %s3549_s11, [#allocation16]  }
 0x8da   :  { %s3027_s28 = smov [#allocation14]  }
 0x8db   :  { %s2256_s5 = sshll.u32 %s3027_s28, 4  ;;  %s2257_s5 = int_to_ptr.vmem [resolvable:$true] %s2256_s5 }
 0x8dc   :  { %s2974_s1 = scalar_lea.vmem %s2257_s5, 128  ;;  %p2979_p9 = scmp.lt.s32.totalorder %s2257_s5, %s2257_s5 }
 0x8dd   :  { %p2975_p8 = scmp.ne.s32.totalorder %s2257_s5, %s2974_s1  ;;  %p2980_p10 = scmp.lt.s32.totalorder %s2974_s1, %s2974_s1 }
 0x8df   :  { %p2981_p11 = por %p2980_p10, %p2979_p9 }
 0x8e1   :  { %p2982_p12 = pnand %p2981_p11, %p2975_p8 }
 0x95e   :  { %v2246_v16 = vpop.xlane.xlu1 %2245 }
 0x95f   :  { %2796 = vrcp.f32 %v2246_v16 }
 0x969   :  { %v2797_v20 = vpop.eup %2796 }
 0x96a   :  { %v2248_v22 = vmul.f32 %v2797_v20, %v2795_v19 }
 0x96c   :  { %2249 = vst [vmem:[#allocation14] sm:$0xff] %v2248_v22 }
 0x96d   :  { %2985 = shalt.err (!%p2982_p12)
}
 0x96e   :  { %s2986_s7 = scalar_lea.hbm %s3548_s10, 128 }
 0x96f   :  { %p2987_p13 = scmp.ne.s32.totalorder %s3548_s10, %s2986_s7  ;;  %p2990_p0 = scmp.lt.u32.totalorder %s2986_s7, %s3548_s10 }
 0x971   :  { %p2992_p1 = pnand %p2990_p0, %p2987_p13 }
 0x973   :  { %2995 = shalt.err (!%p2992_p1)
}
 0x974   :  { %2259 = dma.vmem_to_hbm [thread:$0]  %s2257_s5, 128, %s3548_s10, [#allocation4]  }
 0x975   :  { %3004 = dma.done.wait [#allocation4], 128  }
 0x976   :  { %3005 = vsyncadd [#allocation4], 4294967168 }
 0x977   :  { %3006 = dma.done.wait [#allocation16], 128  }
 0x978   :  { %3007 = vsyncadd [#allocation16], 4294967168 }
 0x979   :  { %2276 = vsyncpa [#allocation3], 1 }
 0x97a   :  { %2277 = vsyncpa [#allocation6], 1 }
 0x97b   :  { %2278 = vsyncpa [#allocation9], 1 }
 0x97c   :  { %2279 = vsyncpa [#allocation12], 1 }
 0x97d   :  { %2280 = vsyncpa [#allocation4], 1 }
 0x97e   :  { %2281 = vsyncpa [#allocation16], 1 }

</bundles_post_ra>
